<compile_context>
chip_gen: v6e
topology: v6e:2x2x1
jax: 0.10.0
libtpu: 0.0.40
codegen_flags: <defaults>
</compile_context>

<pallas_src>
import math
import functools

import jax
import jax.numpy as jnp
from jax import lax
from jax.experimental import pallas as pl
from jax.experimental.pallas import tpu as pltpu

# ----------------------------- config ---------------------------------------
N_EMBD = 32
N_HEAD = 4
SEQ_LEN = 8
BATCH = 2
LN_EPS = 1e-5
MATMUL_DTYPE = jnp.bfloat16   # MXU-native operand dtype; accumulation is f32


# ----------------------------- kernel ---------------------------------------
def block_kernel(
    x_ref,        # (B*T, C)     f32
    ln1w_ref,     # (1, C)       f32
    ln1b_ref,     # (1, C)       f32
    wq_ref,       # (H, C, hd)   bf16   (1/sqrt(hd) folded in)
    bq_ref,       # (H, 1, hd)   f32    (1/sqrt(hd) folded in)
    wk_ref,       # (H, C, hd)   bf16
    bk_ref,       # (H, 1, hd)   f32
    wv_ref,       # (H, C, hd)   bf16
    bv_ref,       # (H, 1, hd)   f32
    wproj_ref,    # (H, hd, C)   bf16
    bproj_ref,    # (1, C)       f32
    ln2w_ref,     # (1, C)       f32
    ln2b_ref,     # (1, C)       f32
    wfc_ref,      # (C, 4C)      bf16
    bfc_ref,      # (1, 4C)      f32
    wfc2_ref,     # (4C, C)      bf16
    bfc2_ref,     # (1, C)       f32
    o_ref,        # (B*T, C)     f32
    *,
    batch: int,
    n_head: int,
):
    x = x_ref[...]                       # (B*T, C) f32
    BT, C = x.shape
    T = BT // batch

    def layernorm(v, w_ref, b_ref):
        mu = jnp.mean(v, axis=-1, keepdims=True)
        xc = v - mu                                   # reused for var and output
        var = jnp.mean(xc * xc, axis=-1, keepdims=True)
        return xc * lax.rsqrt(var + LN_EPS) * w_ref[0] + b_ref[0]

    # ---------------- attention branch ----------------
    h = layernorm(x, ln1w_ref, ln1b_ref).astype(MATMUL_DTYPE)   # (BT, C) bf16

    # Causal mask built once per kernel invocation.
    row = lax.broadcasted_iota(jnp.int32, (T, T), 0)
    col = lax.broadcasted_iota(jnp.int32, (T, T), 1)
    causal = (col <= row)[None, :, :]                 # (1, T, T)

    # Per-head loop (static unroll). Head weights are pre-split on the host,
    # so there are NO lane slices and NO lane-axis concat: the output
    # projection is accumulated per head into attn_acc (f32).
    attn_acc = jnp.zeros((BT, C), jnp.float32)
    for hh in range(n_head):
        q = (jnp.dot(h, wq_ref[hh], preferred_element_type=jnp.float32)
             + bq_ref[hh]).reshape(batch, T, -1).astype(MATMUL_DTYPE)
        k = (jnp.dot(h, wk_ref[hh], preferred_element_type=jnp.float32)
             + bk_ref[hh]).reshape(batch, T, -1).astype(MATMUL_DTYPE)
        v = (jnp.dot(h, wv_ref[hh], preferred_element_type=jnp.float32)
             + bv_ref[hh]).reshape(batch, T, -1).astype(MATMUL_DTYPE)

        # batched (over B) MXU matmuls, f32 accumulation; scale already folded.
        s = jnp.einsum("bqd,bkd->bqk", q, k,
                       preferred_element_type=jnp.float32)         # (B, T, T)
        # -1e30 fill is safe only because scores stay f32.
        s = jnp.where(causal, s, -1e30)
        s = s - jnp.max(s, axis=-1, keepdims=True)
        p = jnp.exp(s)
        # EUP approx reciprocal: its own VLIW slot, effectively free.
        p = p * pl.reciprocal(jnp.sum(p, axis=-1, keepdims=True), approx=True)
        yh = jnp.einsum("bqk,bkd->bqd", p.astype(MATMUL_DTYPE), v,
                        preferred_element_type=jnp.float32)         # (B, T, hd)

        # Fold the output projection into the head loop (no concat of heads).
        attn_acc = attn_acc + jnp.dot(
            yh.reshape(BT, -1).astype(MATMUL_DTYPE), wproj_ref[hh],
            preferred_element_type=jnp.float32)

    x = x + attn_acc + bproj_ref[0]

    # ---------------- MLP branch ----------------
    h2 = layernorm(x, ln2w_ref, ln2b_ref).astype(MATMUL_DTYPE)
    fc = jnp.dot(h2, wfc_ref[...], preferred_element_type=jnp.float32) + bfc_ref[0]
    # GELU (tanh approximation), matching nn.GELU(approximate='tanh'); f32 math.
    c = math.sqrt(2.0 / math.pi)
    g = 0.5 * fc * (1.0 + jnp.tanh(c * (fc + 0.044715 * fc * fc * fc)))
    mlp_out = jnp.dot(g.astype(MATMUL_DTYPE), wfc2_ref[...],
                      preferred_element_type=jnp.float32) + bfc2_ref[0]

    o_ref[...] = (x + mlp_out).astype(o_ref.dtype)


# ----------------------- one-time host-side parameter prep -------------------
def prepare_kernel_params(raw_params, n_head=N_HEAD):
    """Run ONCE at init: bf16 cast, per-head splits, attention-scale folding."""
    (ln1w, ln1b, w_attn, b_attn, wproj, bproj,
     ln2w, ln2b, wfc, bfc, wfc2, bfc2) = raw_params
    C = w_attn.shape[0]
    hd = C // n_head
    scale = 1.0 / math.sqrt(hd)

    wq, wk, wv = w_attn[:, :C], w_attn[:, C:2 * C], w_attn[:, 2 * C:]
    bq, bk, bv = b_attn[:, :C], b_attn[:, C:2 * C], b_attn[:, 2 * C:]

    def split_heads_w(w):   # (C, C) -> (H, C, hd)
        return jnp.transpose(w.reshape(C, n_head, hd), (1, 0, 2))

    def split_heads_b(b):   # (1, C) -> (H, 1, hd)
        return b.reshape(n_head, 1, hd)

    wq_h = split_heads_w(wq * scale).astype(MATMUL_DTYPE)
    bq_h = split_heads_b(bq * scale)
    wk_h = split_heads_w(wk).astype(MATMUL_DTYPE)
    bk_h = split_heads_b(bk)
    wv_h = split_heads_w(wv).astype(MATMUL_DTYPE)
    bv_h = split_heads_b(bv)
    wproj_h = wproj.reshape(n_head, hd, C).astype(MATMUL_DTYPE)

    return (ln1w, ln1b, wq_h, bq_h, wk_h, bk_h, wv_h, bv_h,
            wproj_h, bproj, ln2w, ln2b,
            wfc.astype(MATMUL_DTYPE), bfc, wfc2.astype(MATMUL_DTYPE), bfc2)


# ----------------------------- wrapper ---------------------------------------
@jax.jit
def block_forward(x, kernel_params):
    B, T, C = x.shape
    n_head = kernel_params[2].shape[0]        # wq_h: (H, C, hd)

    # Fold the batch: one kernel invocation sees all B*T rows.
    # NOTE(v7x): with 2 TensorCores/chip one would instead keep a row-tile
    # grid axis marked "parallel" so each core takes half the rows.
    x2d = x.reshape(B * T, C)

    kernel = functools.partial(block_kernel, batch=B, n_head=n_head)
    n_inputs = 1 + len(kernel_params)

    out2d = pl.pallas_call(
        kernel,
        out_shape=jax.ShapeDtypeStruct((B * T, C), x.dtype),
        in_specs=[pl.BlockSpec(memory_space=pltpu.MemorySpace.VMEM)] * n_inputs,
        out_specs=pl.BlockSpec(memory_space=pltpu.MemorySpace.VMEM),
        input_output_aliases={0: 0},          # output reuses x2d's HBM buffer
    )(x2d, *kernel_params)
    return out2d.reshape(B, T, C)


# ----------------------------- reference (pure JAX, f32) ----------------------
def block_reference(x, raw_params, n_head=N_HEAD):
    (ln1w, ln1b, w_attn, b_attn, wproj, bproj,
     ln2w, ln2b, wfc, bfc, wfc2, bfc2) = raw_params
    B, T, C = x.shape
    hd = C // n_head

    def ln(v, w, b):
        mu = v.mean(-1, keepdims=True)
        var = ((v - mu) ** 2).mean(-1, keepdims=True)
        return (v - mu) / jnp.sqrt(var + LN_EPS) * w[0] + b[0]

    h = ln(x, ln1w, ln1b)
    qkv = h @ w_attn + b_attn[0]
    q, k, v = jnp.split(qkv, 3, axis=-1)
    q = q.reshape(B, T, n_head, hd).transpose(0, 2, 1, 3)
    k = k.reshape(B, T, n_head, hd).transpose(0, 2, 1, 3)
    v = v.reshape(B, T, n_head, hd).transpose(0, 2, 1, 3)
    s = jnp.einsum("bhqd,bhkd->bhqk", q, k) / math.sqrt(hd)
    causal = jnp.tril(jnp.ones((T, T), bool))
    s = jnp.where(causal, s, -jnp.inf)
    p = jax.nn.softmax(s, axis=-1)
    y = jnp.einsum("bhqk,bhkd->bhqd", p, v)
    y = y.transpose(0, 2, 1, 3).reshape(B, T, C)
    x = x + y @ wproj + bproj[0]

    h2 = ln(x, ln2w, ln2b)
    fc = h2 @ wfc + bfc[0]
    c = math.sqrt(2.0 / math.pi)
    g = 0.5 * fc * (1.0 + jnp.tanh(c * (fc + 0.044715 * fc ** 3)))
    return x + g @ wfc2 + bfc2[0]


# ----------------------------- main -------------------------------------------
if __name__ == "__main__":
    C = N_EMBD
    keys = jax.random.split(jax.random.PRNGKey(0), 10)

    # Deterministic parameter init. Linear weights are stored pre-transposed as
    # (in_features, out_features) so y = x @ W + b (== torch's x @ W.T + b).
    # c_attn is kept fused (C, 3C) to mirror the PyTorch module; it is split
    # per head once in prepare_kernel_params.
    ln1w = jnp.ones((1, C), jnp.float32)
    ln1b = jnp.zeros((1, C), jnp.float32)
    w_attn = 0.02 * jax.random.normal(keys[0], (C, 3 * C), jnp.float32)
    b_attn = 0.02 * jax.random.normal(keys[1], (1, 3 * C), jnp.float32)
    wproj = 0.02 * jax.random.normal(keys[2], (C, C), jnp.float32)
    bproj = 0.02 * jax.random.normal(keys[3], (1, C), jnp.float32)
    ln2w = jnp.ones((1, C), jnp.float32)
    ln2b = jnp.zeros((1, C), jnp.float32)
    wfc = 0.02 * jax.random.normal(keys[4], (C, 4 * C), jnp.float32)
    bfc = 0.02 * jax.random.normal(keys[5], (1, 4 * C), jnp.float32)
    wfc2 = 0.02 * jax.random.normal(keys[6], (4 * C, C), jnp.float32)
    bfc2 = 0.02 * jax.random.normal(keys[7], (1, C), jnp.float32)

    raw_params = (ln1w, ln1b, w_attn, b_attn, wproj, bproj,
                  ln2w, ln2b, wfc, bfc, wfc2, bfc2)

    # One-time prep: bf16 cast + per-head splits + scale folding (not per call).
    kernel_params = prepare_kernel_params(raw_params, N_HEAD)
    kernel_params = jax.tree_util.tree_map(jax.block_until_ready, kernel_params)

    x = jax.random.normal(jax.random.PRNGKey(42), (BATCH, SEQ_LEN, C), jnp.float32)

    out = jax.block_until_ready(block_forward(x, kernel_params))
    ref = block_reference(x, raw_params, N_HEAD)

    assert out.shape == (BATCH, SEQ_LEN, C)
    max_err = float(jnp.max(jnp.abs(out - ref)))
    # bf16 matmul operands (f32 accumulation) + approx reciprocal -> loose tol.
    assert jnp.allclose(out, ref, atol=2e-2, rtol=2e-2), f"max abs err {max_err}"

    print("KERNEL_OK")
</pallas_src>

<mosaic_0001>
module attributes {stable_mosaic.version = 11 : i64} {
  func.func @block_kernel(%arg0: memref<16x32xf32, #tpu.memory_space<vmem>>, %arg1: memref<1x32xf32, #tpu.memory_space<vmem>>, %arg2: memref<1x32xf32, #tpu.memory_space<vmem>>, %arg3: memref<4x32x8xbf16, #tpu.memory_space<vmem>>, %arg4: memref<4x1x8xf32, #tpu.memory_space<vmem>>, %arg5: memref<4x32x8xbf16, #tpu.memory_space<vmem>>, %arg6: memref<4x1x8xf32, #tpu.memory_space<vmem>>, %arg7: memref<4x32x8xbf16, #tpu.memory_space<vmem>>, %arg8: memref<4x1x8xf32, #tpu.memory_space<vmem>>, %arg9: memref<4x8x32xbf16, #tpu.memory_space<vmem>>, %arg10: memref<1x32xf32, #tpu.memory_space<vmem>>, %arg11: memref<1x32xf32, #tpu.memory_space<vmem>>, %arg12: memref<1x32xf32, #tpu.memory_space<vmem>>, %arg13: memref<32x128xbf16, #tpu.memory_space<vmem>>, %arg14: memref<1x128xf32, #tpu.memory_space<vmem>>, %arg15: memref<128x32xbf16, #tpu.memory_space<vmem>>, %arg16: memref<1x32xf32, #tpu.memory_space<vmem>>, %arg17: memref<16x32xf32, #tpu.memory_space<vmem>>) attributes {dimension_semantics = [], scalar_prefetch = 0 : i64, scratch_operands = 0 : i64, tpu.core_type = #tpu.core_type<tc>} {
    %c0 = arith.constant 0 : index
    %c0_0 = arith.constant 0 : index
    %0 = vector.load %arg0[%c0, %c0_0] : memref<16x32xf32, #tpu.memory_space<vmem>>, vector<16x32xf32>
    %cst = arith.constant dense<0.000000e+00> : vector<16xf32>
    %1 = vector.multi_reduction <add>, %0, %cst [1] : vector<16x32xf32> to vector<16xf32>
    %2 = vector.shape_cast %1 : vector<16xf32> to vector<16x1xf32>
    %cst_1 = arith.constant 3.200000e+01 : f32
    %3 = vector.broadcast %cst_1 : f32 to vector<16x1xf32>
    %4 = arith.divf %2, %3 : vector<16x1xf32>
    %5 = vector.broadcast %4 : vector<16x1xf32> to vector<16x32xf32>
    %6 = arith.subf %0, %5 : vector<16x32xf32>
    %7 = arith.mulf %6, %6 : vector<16x32xf32>
    %cst_2 = arith.constant dense<0.000000e+00> : vector<16xf32>
    %8 = vector.multi_reduction <add>, %7, %cst_2 [1] : vector<16x32xf32> to vector<16xf32>
    %9 = vector.shape_cast %8 : vector<16xf32> to vector<16x1xf32>
    %cst_3 = arith.constant 3.200000e+01 : f32
    %10 = vector.broadcast %cst_3 : f32 to vector<16x1xf32>
    %11 = arith.divf %9, %10 : vector<16x1xf32>
    %cst_4 = arith.constant 9.99999974E-6 : f32
    %12 = vector.broadcast %cst_4 : f32 to vector<16x1xf32>
    %13 = arith.addf %11, %12 : vector<16x1xf32>
    %14 = math.rsqrt %13 : vector<16x1xf32>
    %15 = vector.broadcast %14 : vector<16x1xf32> to vector<16x32xf32>
    %16 = arith.mulf %6, %15 : vector<16x32xf32>
    %c0_5 = arith.constant 0 : index
    %c0_6 = arith.constant 0 : index
    %17 = vector.load %arg1[%c0_5, %c0_6] : memref<1x32xf32, #tpu.memory_space<vmem>>, vector<1x32xf32>
    %18 = vector.shape_cast %17 : vector<1x32xf32> to vector<32xf32>
    %19 = vector.shape_cast %18 : vector<32xf32> to vector<1x32xf32>
    %20 = vector.broadcast %19 : vector<1x32xf32> to vector<16x32xf32>
    %21 = arith.mulf %16, %20 : vector<16x32xf32>
    %c0_7 = arith.constant 0 : index
    %c0_8 = arith.constant 0 : index
    %22 = vector.load %arg2[%c0_7, %c0_8] : memref<1x32xf32, #tpu.memory_space<vmem>>, vector<1x32xf32>
    %23 = vector.shape_cast %22 : vector<1x32xf32> to vector<32xf32>
    %24 = vector.shape_cast %23 : vector<32xf32> to vector<1x32xf32>
    %25 = vector.broadcast %24 : vector<1x32xf32> to vector<16x32xf32>
    %26 = arith.addf %21, %25 : vector<16x32xf32>
    %27 = arith.truncf %26 : vector<16x32xf32> to vector<16x32xbf16>
    %28 = tpu.iota {dimensions = array<i32: 0>} : vector<8x8xi32>
    %29 = tpu.iota {dimensions = array<i32: 1>} : vector<8x8xi32>
    %30 = arith.cmpi sle, %29, %28 : vector<8x8xi32>
    %31 = vector.shape_cast %30 : vector<8x8xi1> to vector<1x8x8xi1>
    %cst_9 = arith.constant 0.000000e+00 : f32
    %32 = vector.broadcast %cst_9 : f32 to vector<16x32xf32>
    %c0_10 = arith.constant 0 : index
    %c0_11 = arith.constant 0 : index
    %c0_12 = arith.constant 0 : index
    %33 = vector.load %arg3[%c0_10, %c0_11, %c0_12] : memref<4x32x8xbf16, #tpu.memory_space<vmem>>, vector<1x32x8xbf16>
    %34 = vector.shape_cast %33 : vector<1x32x8xbf16> to vector<32x8xbf16>
    %cst_13 = arith.constant dense<0.000000e+00> : vector<16x8xf32>
    %35 = tpu.matmul %27, %34, %cst_13 {dimension_numbers = #tpu.dot_dimension_numbers<[1], [0], [0], [1], [0, 0, 1, 1], [], []>} : vector<16x32xbf16>, vector<32x8xbf16>, vector<16x8xf32> -> vector<16x8xf32>
    %c0_14 = arith.constant 0 : index
    %c0_15 = arith.constant 0 : index
    %c0_16 = arith.constant 0 : index
    %36 = vector.load %arg4[%c0_14, %c0_15, %c0_16] : memref<4x1x8xf32, #tpu.memory_space<vmem>>, vector<1x1x8xf32>
    %37 = vector.shape_cast %36 : vector<1x1x8xf32> to vector<1x8xf32>
    %38 = vector.broadcast %37 : vector<1x8xf32> to vector<16x8xf32>
    %39 = arith.addf %35, %38 : vector<16x8xf32>
    %40 = vector.shape_cast %39 : vector<16x8xf32> to vector<2x8x8xf32>
    %41 = arith.truncf %40 : vector<2x8x8xf32> to vector<2x8x8xbf16>
    %c0_17 = arith.constant 0 : index
    %c0_18 = arith.constant 0 : index
    %c0_19 = arith.constant 0 : index
    %42 = vector.load %arg5[%c0_17, %c0_18, %c0_19] : memref<4x32x8xbf16, #tpu.memory_space<vmem>>, vector<1x32x8xbf16>
    %43 = vector.shape_cast %42 : vector<1x32x8xbf16> to vector<32x8xbf16>
    %cst_20 = arith.constant dense<0.000000e+00> : vector<16x8xf32>
    %44 = tpu.matmul %27, %43, %cst_20 {dimension_numbers = #tpu.dot_dimension_numbers<[1], [0], [0], [1], [0, 0, 1, 1], [], []>} : vector<16x32xbf16>, vector<32x8xbf16>, vector<16x8xf32> -> vector<16x8xf32>
    %c0_21 = arith.constant 0 : index
    %c0_22 = arith.constant 0 : index
    %c0_23 = arith.constant 0 : index
    %45 = vector.load %arg6[%c0_21, %c0_22, %c0_23] : memref<4x1x8xf32, #tpu.memory_space<vmem>>, vector<1x1x8xf32>
    %46 = vector.shape_cast %45 : vector<1x1x8xf32> to vector<1x8xf32>
    %47 = vector.broadcast %46 : vector<1x8xf32> to vector<16x8xf32>
    %48 = arith.addf %44, %47 : vector<16x8xf32>
    %49 = vector.shape_cast %48 : vector<16x8xf32> to vector<2x8x8xf32>
    %50 = arith.truncf %49 : vector<2x8x8xf32> to vector<2x8x8xbf16>
    %c0_24 = arith.constant 0 : index
    %c0_25 = arith.constant 0 : index
    %c0_26 = arith.constant 0 : index
    %51 = vector.load %arg7[%c0_24, %c0_25, %c0_26] : memref<4x32x8xbf16, #tpu.memory_space<vmem>>, vector<1x32x8xbf16>
    %52 = vector.shape_cast %51 : vector<1x32x8xbf16> to vector<32x8xbf16>
    %cst_27 = arith.constant dense<0.000000e+00> : vector<16x8xf32>
    %53 = tpu.matmul %27, %52, %cst_27 {dimension_numbers = #tpu.dot_dimension_numbers<[1], [0], [0], [1], [0, 0, 1, 1], [], []>} : vector<16x32xbf16>, vector<32x8xbf16>, vector<16x8xf32> -> vector<16x8xf32>
    %c0_28 = arith.constant 0 : index
    %c0_29 = arith.constant 0 : index
    %c0_30 = arith.constant 0 : index
    %54 = vector.load %arg8[%c0_28, %c0_29, %c0_30] : memref<4x1x8xf32, #tpu.memory_space<vmem>>, vector<1x1x8xf32>
    %55 = vector.shape_cast %54 : vector<1x1x8xf32> to vector<1x8xf32>
    %56 = vector.broadcast %55 : vector<1x8xf32> to vector<16x8xf32>
    %57 = arith.addf %53, %56 : vector<16x8xf32>
    %58 = vector.shape_cast %57 : vector<16x8xf32> to vector<2x8x8xf32>
    %59 = arith.truncf %58 : vector<2x8x8xf32> to vector<2x8x8xbf16>
    "tpu.trace_start"() <{level = 10 : i32, message = "bqd,bkd->bqk"}> : () -> ()
    %cst_31 = arith.constant dense<0.000000e+00> : vector<2x8x8xf32>
    %60 = tpu.matmul %41, %50, %cst_31 {dimension_numbers = #tpu.dot_dimension_numbers<[2], [2], [1], [1], [0, 0, 0, 1, 1, 1], [0], [0]>} : vector<2x8x8xbf16>, vector<2x8x8xbf16>, vector<2x8x8xf32> -> vector<2x8x8xf32>
    %cst_32 = arith.constant -1.000000e+30 : f32
    "tpu.trace_stop"() : () -> ()
    %61 = vector.shape_cast %31 : vector<1x8x8xi1> to vector<1x8x8xi1>
    %62 = vector.broadcast %61 : vector<1x8x8xi1> to vector<2x8x8xi1>
    %63 = vector.broadcast %cst_32 : f32 to vector<2x8x8xf32>
    %64 = arith.select %62, %60, %63 : vector<2x8x8xi1>, vector<2x8x8xf32>
    %cst_33 = arith.constant dense<0xFF800000> : vector<2x8xf32>
    %65 = vector.multi_reduction <maximumf>, %64, %cst_33 [2] : vector<2x8x8xf32> to vector<2x8xf32>
    %66 = vector.shape_cast %65 : vector<2x8xf32> to vector<2x8x1xf32>
    %67 = vector.broadcast %66 : vector<2x8x1xf32> to vector<2x8x8xf32>
    %68 = arith.subf %64, %67 : vector<2x8x8xf32>
    %69 = math.exp %68 : vector<2x8x8xf32>
    %cst_34 = arith.constant dense<0.000000e+00> : vector<2x8xf32>
    %70 = vector.multi_reduction <add>, %69, %cst_34 [2] : vector<2x8x8xf32> to vector<2x8xf32>
    %71 = vector.shape_cast %70 : vector<2x8xf32> to vector<2x8x1xf32>
    %72 = tpu.reciprocal %71 {approx = true} : vector<2x8x1xf32> -> vector<2x8x1xf32>
    %73 = vector.broadcast %72 : vector<2x8x1xf32> to vector<2x8x8xf32>
    %74 = arith.mulf %69, %73 : vector<2x8x8xf32>
    %75 = arith.truncf %74 : vector<2x8x8xf32> to vector<2x8x8xbf16>
    "tpu.trace_start"() <{level = 10 : i32, message = "bqk,bkd->bqd"}> : () -> ()
    %cst_35 = arith.constant dense<0.000000e+00> : vector<2x8x8xf32>
    %76 = tpu.matmul %75, %59, %cst_35 {dimension_numbers = #tpu.dot_dimension_numbers<[2], [1], [1], [2], [0, 0, 0, 1, 1, 2], [0], [0]>} : vector<2x8x8xbf16>, vector<2x8x8xbf16>, vector<2x8x8xf32> -> vector<2x8x8xf32>
    "tpu.trace_stop"() : () -> ()
    %77 = vector.shape_cast %76 : vector<2x8x8xf32> to vector<16x8xf32>
    %78 = arith.truncf %77 : vector<16x8xf32> to vector<16x8xbf16>
    %c0_36 = arith.constant 0 : index
    %c0_37 = arith.constant 0 : index
    %c0_38 = arith.constant 0 : index
    %79 = vector.load %arg9[%c0_36, %c0_37, %c0_38] : memref<4x8x32xbf16, #tpu.memory_space<vmem>>, vector<1x8x32xbf16>
    %80 = vector.shape_cast %79 : vector<1x8x32xbf16> to vector<8x32xbf16>
    %cst_39 = arith.constant dense<0.000000e+00> : vector<16x32xf32>
    %81 = tpu.matmul %78, %80, %cst_39 {dimension_numbers = #tpu.dot_dimension_numbers<[1], [0], [0], [1], [0, 0, 1, 1], [], []>} : vector<16x8xbf16>, vector<8x32xbf16>, vector<16x32xf32> -> vector<16x32xf32>
    %82 = arith.addf %32, %81 : vector<16x32xf32>
    %c1 = arith.constant 1 : index
    %c0_40 = arith.constant 0 : index
    %c0_41 = arith.constant 0 : index
    %83 = vector.load %arg3[%c1, %c0_40, %c0_41] : memref<4x32x8xbf16, #tpu.memory_space<vmem>>, vector<1x32x8xbf16>
    %84 = vector.shape_cast %83 : vector<1x32x8xbf16> to vector<32x8xbf16>
    %cst_42 = arith.constant dense<0.000000e+00> : vector<16x8xf32>
    %85 = tpu.matmul %27, %84, %cst_42 {dimension_numbers = #tpu.dot_dimension_numbers<[1], [0], [0], [1], [0, 0, 1, 1], [], []>} : vector<16x32xbf16>, vector<32x8xbf16>, vector<16x8xf32> -> vector<16x8xf32>
    %c1_43 = arith.constant 1 : index
    %c0_44 = arith.constant 0 : index
    %c0_45 = arith.constant 0 : index
    %86 = vector.load %arg4[%c1_43, %c0_44, %c0_45] : memref<4x1x8xf32, #tpu.memory_space<vmem>>, vector<1x1x8xf32>
    %87 = vector.shape_cast %86 : vector<1x1x8xf32> to vector<1x8xf32>
    %88 = vector.broadcast %87 : vector<1x8xf32> to vector<16x8xf32>
    %89 = arith.addf %85, %88 : vector<16x8xf32>
    %90 = vector.shape_cast %89 : vector<16x8xf32> to vector<2x8x8xf32>
    %91 = arith.truncf %90 : vector<2x8x8xf32> to vector<2x8x8xbf16>
    %c1_46 = arith.constant 1 : index
    %c0_47 = arith.constant 0 : index
    %c0_48 = arith.constant 0 : index
    %92 = vector.load %arg5[%c1_46, %c0_47, %c0_48] : memref<4x32x8xbf16, #tpu.memory_space<vmem>>, vector<1x32x8xbf16>
    %93 = vector.shape_cast %92 : vector<1x32x8xbf16> to vector<32x8xbf16>
    %cst_49 = arith.constant dense<0.000000e+00> : vector<16x8xf32>
    %94 = tpu.matmul %27, %93, %cst_49 {dimension_numbers = #tpu.dot_dimension_numbers<[1], [0], [0], [1], [0, 0, 1, 1], [], []>} : vector<16x32xbf16>, vector<32x8xbf16>, vector<16x8xf32> -> vector<16x8xf32>
    %c1_50 = arith.constant 1 : index
    %c0_51 = arith.constant 0 : index
    %c0_52 = arith.constant 0 : index
    %95 = vector.load %arg6[%c1_50, %c0_51, %c0_52] : memref<4x1x8xf32, #tpu.memory_space<vmem>>, vector<1x1x8xf32>
    %96 = vector.shape_cast %95 : vector<1x1x8xf32> to vector<1x8xf32>
    %97 = vector.broadcast %96 : vector<1x8xf32> to vector<16x8xf32>
    %98 = arith.addf %94, %97 : vector<16x8xf32>
    %99 = vector.shape_cast %98 : vector<16x8xf32> to vector<2x8x8xf32>
    %100 = arith.truncf %99 : vector<2x8x8xf32> to vector<2x8x8xbf16>
    %c1_53 = arith.constant 1 : index
    %c0_54 = arith.constant 0 : index
    %c0_55 = arith.constant 0 : index
    %101 = vector.load %arg7[%c1_53, %c0_54, %c0_55] : memref<4x32x8xbf16, #tpu.memory_space<vmem>>, vector<1x32x8xbf16>
    %102 = vector.shape_cast %101 : vector<1x32x8xbf16> to vector<32x8xbf16>
    %cst_56 = arith.constant dense<0.000000e+00> : vector<16x8xf32>
    %103 = tpu.matmul %27, %102, %cst_56 {dimension_numbers = #tpu.dot_dimension_numbers<[1], [0], [0], [1], [0, 0, 1, 1], [], []>} : vector<16x32xbf16>, vector<32x8xbf16>, vector<16x8xf32> -> vector<16x8xf32>
    %c1_57 = arith.constant 1 : index
    %c0_58 = arith.constant 0 : index
    %c0_59 = arith.constant 0 : index
    %104 = vector.load %arg8[%c1_57, %c0_58, %c0_59] : memref<4x1x8xf32, #tpu.memory_space<vmem>>, vector<1x1x8xf32>
    %105 = vector.shape_cast %104 : vector<1x1x8xf32> to vector<1x8xf32>
    %106 = vector.broadcast %105 : vector<1x8xf32> to vector<16x8xf32>
    %107 = arith.addf %103, %106 : vector<16x8xf32>
    %108 = vector.shape_cast %107 : vector<16x8xf32> to vector<2x8x8xf32>
    %109 = arith.truncf %108 : vector<2x8x8xf32> to vector<2x8x8xbf16>
    "tpu.trace_start"() <{level = 10 : i32, message = "bqd,bkd->bqk"}> : () -> ()
    %cst_60 = arith.constant dense<0.000000e+00> : vector<2x8x8xf32>
    %110 = tpu.matmul %91, %100, %cst_60 {dimension_numbers = #tpu.dot_dimension_numbers<[2], [2], [1], [1], [0, 0, 0, 1, 1, 1], [0], [0]>} : vector<2x8x8xbf16>, vector<2x8x8xbf16>, vector<2x8x8xf32> -> vector<2x8x8xf32>
    %cst_61 = arith.constant -1.000000e+30 : f32
    "tpu.trace_stop"() : () -> ()
    %111 = vector.shape_cast %31 : vector<1x8x8xi1> to vector<1x8x8xi1>
    %112 = vector.broadcast %111 : vector<1x8x8xi1> to vector<2x8x8xi1>
    %113 = vector.broadcast %cst_61 : f32 to vector<2x8x8xf32>
    %114 = arith.select %112, %110, %113 : vector<2x8x8xi1>, vector<2x8x8xf32>
    %cst_62 = arith.constant dense<0xFF800000> : vector<2x8xf32>
    %115 = vector.multi_reduction <maximumf>, %114, %cst_62 [2] : vector<2x8x8xf32> to vector<2x8xf32>
    %116 = vector.shape_cast %115 : vector<2x8xf32> to vector<2x8x1xf32>
    %117 = vector.broadcast %116 : vector<2x8x1xf32> to vector<2x8x8xf32>
    %118 = arith.subf %114, %117 : vector<2x8x8xf32>
    %119 = math.exp %118 : vector<2x8x8xf32>
    %cst_63 = arith.constant dense<0.000000e+00> : vector<2x8xf32>
    %120 = vector.multi_reduction <add>, %119, %cst_63 [2] : vector<2x8x8xf32> to vector<2x8xf32>
    %121 = vector.shape_cast %120 : vector<2x8xf32> to vector<2x8x1xf32>
    %122 = tpu.reciprocal %121 {approx = true} : vector<2x8x1xf32> -> vector<2x8x1xf32>
    %123 = vector.broadcast %122 : vector<2x8x1xf32> to vector<2x8x8xf32>
    %124 = arith.mulf %119, %123 : vector<2x8x8xf32>
    %125 = arith.truncf %124 : vector<2x8x8xf32> to vector<2x8x8xbf16>
    "tpu.trace_start"() <{level = 10 : i32, message = "bqk,bkd->bqd"}> : () -> ()
    %cst_64 = arith.constant dense<0.000000e+00> : vector<2x8x8xf32>
    %126 = tpu.matmul %125, %109, %cst_64 {dimension_numbers = #tpu.dot_dimension_numbers<[2], [1], [1], [2], [0, 0, 0, 1, 1, 2], [0], [0]>} : vector<2x8x8xbf16>, vector<2x8x8xbf16>, vector<2x8x8xf32> -> vector<2x8x8xf32>
    "tpu.trace_stop"() : () -> ()
    %127 = vector.shape_cast %126 : vector<2x8x8xf32> to vector<16x8xf32>
    %128 = arith.truncf %127 : vector<16x8xf32> to vector<16x8xbf16>
    %c1_65 = arith.constant 1 : index
    %c0_66 = arith.constant 0 : index
    %c0_67 = arith.constant 0 : index
    %129 = vector.load %arg9[%c1_65, %c0_66, %c0_67] : memref<4x8x32xbf16, #tpu.memory_space<vmem>>, vector<1x8x32xbf16>
    %130 = vector.shape_cast %129 : vector<1x8x32xbf16> to vector<8x32xbf16>
    %cst_68 = arith.constant dense<0.000000e+00> : vector<16x32xf32>
    %131 = tpu.matmul %128, %130, %cst_68 {dimension_numbers = #tpu.dot_dimension_numbers<[1], [0], [0], [1], [0, 0, 1, 1], [], []>} : vector<16x8xbf16>, vector<8x32xbf16>, vector<16x32xf32> -> vector<16x32xf32>
    %132 = arith.addf %82, %131 : vector<16x32xf32>
    %c2 = arith.constant 2 : index
    %c0_69 = arith.constant 0 : index
    %c0_70 = arith.constant 0 : index
    %133 = vector.load %arg3[%c2, %c0_69, %c0_70] : memref<4x32x8xbf16, #tpu.memory_space<vmem>>, vector<1x32x8xbf16>
    %134 = vector.shape_cast %133 : vector<1x32x8xbf16> to vector<32x8xbf16>
    %cst_71 = arith.constant dense<0.000000e+00> : vector<16x8xf32>
    %135 = tpu.matmul %27, %134, %cst_71 {dimension_numbers = #tpu.dot_dimension_numbers<[1], [0], [0], [1], [0, 0, 1, 1], [], []>} : vector<16x32xbf16>, vector<32x8xbf16>, vector<16x8xf32> -> vector<16x8xf32>
    %c2_72 = arith.constant 2 : index
    %c0_73 = arith.constant 0 : index
    %c0_74 = arith.constant 0 : index
    %136 = vector.load %arg4[%c2_72, %c0_73, %c0_74] : memref<4x1x8xf32, #tpu.memory_space<vmem>>, vector<1x1x8xf32>
    %137 = vector.shape_cast %136 : vector<1x1x8xf32> to vector<1x8xf32>
    %138 = vector.broadcast %137 : vector<1x8xf32> to vector<16x8xf32>
    %139 = arith.addf %135, %138 : vector<16x8xf32>
    %140 = vector.shape_cast %139 : vector<16x8xf32> to vector<2x8x8xf32>
    %141 = arith.truncf %140 : vector<2x8x8xf32> to vector<2x8x8xbf16>
    %c2_75 = arith.constant 2 : index
    %c0_76 = arith.constant 0 : index
    %c0_77 = arith.constant 0 : index
    %142 = vector.load %arg5[%c2_75, %c0_76, %c0_77] : memref<4x32x8xbf16, #tpu.memory_space<vmem>>, vector<1x32x8xbf16>
    %143 = vector.shape_cast %142 : vector<1x32x8xbf16> to vector<32x8xbf16>
    %cst_78 = arith.constant dense<0.000000e+00> : vector<16x8xf32>
    %144 = tpu.matmul %27, %143, %cst_78 {dimension_numbers = #tpu.dot_dimension_numbers<[1], [0], [0], [1], [0, 0, 1, 1], [], []>} : vector<16x32xbf16>, vector<32x8xbf16>, vector<16x8xf32> -> vector<16x8xf32>
    %c2_79 = arith.constant 2 : index
    %c0_80 = arith.constant 0 : index
    %c0_81 = arith.constant 0 : index
    %145 = vector.load %arg6[%c2_79, %c0_80, %c0_81] : memref<4x1x8xf32, #tpu.memory_space<vmem>>, vector<1x1x8xf32>
    %146 = vector.shape_cast %145 : vector<1x1x8xf32> to vector<1x8xf32>
    %147 = vector.broadcast %146 : vector<1x8xf32> to vector<16x8xf32>
    %148 = arith.addf %144, %147 : vector<16x8xf32>
    %149 = vector.shape_cast %148 : vector<16x8xf32> to vector<2x8x8xf32>
    %150 = arith.truncf %149 : vector<2x8x8xf32> to vector<2x8x8xbf16>
    %c2_82 = arith.constant 2 : index
    %c0_83 = arith.constant 0 : index
    %c0_84 = arith.constant 0 : index
    %151 = vector.load %arg7[%c2_82, %c0_83, %c0_84] : memref<4x32x8xbf16, #tpu.memory_space<vmem>>, vector<1x32x8xbf16>
    %152 = vector.shape_cast %151 : vector<1x32x8xbf16> to vector<32x8xbf16>
    %cst_85 = arith.constant dense<0.000000e+00> : vector<16x8xf32>
    %153 = tpu.matmul %27, %152, %cst_85 {dimension_numbers = #tpu.dot_dimension_numbers<[1], [0], [0], [1], [0, 0, 1, 1], [], []>} : vector<16x32xbf16>, vector<32x8xbf16>, vector<16x8xf32> -> vector<16x8xf32>
    %c2_86 = arith.constant 2 : index
    %c0_87 = arith.constant 0 : index
    %c0_88 = arith.constant 0 : index
    %154 = vector.load %arg8[%c2_86, %c0_87, %c0_88] : memref<4x1x8xf32, #tpu.memory_space<vmem>>, vector<1x1x8xf32>
    %155 = vector.shape_cast %154 : vector<1x1x8xf32> to vector<1x8xf32>
    %156 = vector.broadcast %155 : vector<1x8xf32> to vector<16x8xf32>
    %157 = arith.addf %153, %156 : vector<16x8xf32>
    %158 = vector.shape_cast %157 : vector<16x8xf32> to vector<2x8x8xf32>
    %159 = arith.truncf %158 : vector<2x8x8xf32> to vector<2x8x8xbf16>
    "tpu.trace_start"() <{level = 10 : i32, message = "bqd,bkd->bqk"}> : () -> ()
    %cst_89 = arith.constant dense<0.000000e+00> : vector<2x8x8xf32>
    %160 = tpu.matmul %141, %150, %cst_89 {dimension_numbers = #tpu.dot_dimension_numbers<[2], [2], [1], [1], [0, 0, 0, 1, 1, 1], [0], [0]>} : vector<2x8x8xbf16>, vector<2x8x8xbf16>, vector<2x8x8xf32> -> vector<2x8x8xf32>
    %cst_90 = arith.constant -1.000000e+30 : f32
    "tpu.trace_stop"() : () -> ()
    %161 = vector.shape_cast %31 : vector<1x8x8xi1> to vector<1x8x8xi1>
    %162 = vector.broadcast %161 : vector<1x8x8xi1> to vector<2x8x8xi1>
    %163 = vector.broadcast %cst_90 : f32 to vector<2x8x8xf32>
    %164 = arith.select %162, %160, %163 : vector<2x8x8xi1>, vector<2x8x8xf32>
    %cst_91 = arith.constant dense<0xFF800000> : vector<2x8xf32>
    %165 = vector.multi_reduction <maximumf>, %164, %cst_91 [2] : vector<2x8x8xf32> to vector<2x8xf32>
    %166 = vector.shape_cast %165 : vector<2x8xf32> to vector<2x8x1xf32>
    %167 = vector.broadcast %166 : vector<2x8x1xf32> to vector<2x8x8xf32>
    %168 = arith.subf %164, %167 : vector<2x8x8xf32>
    %169 = math.exp %168 : vector<2x8x8xf32>
    %cst_92 = arith.constant dense<0.000000e+00> : vector<2x8xf32>
    %170 = vector.multi_reduction <add>, %169, %cst_92 [2] : vector<2x8x8xf32> to vector<2x8xf32>
    %171 = vector.shape_cast %170 : vector<2x8xf32> to vector<2x8x1xf32>
    %172 = tpu.reciprocal %171 {approx = true} : vector<2x8x1xf32> -> vector<2x8x1xf32>
    %173 = vector.broadcast %172 : vector<2x8x1xf32> to vector<2x8x8xf32>
    %174 = arith.mulf %169, %173 : vector<2x8x8xf32>
    %175 = arith.truncf %174 : vector<2x8x8xf32> to vector<2x8x8xbf16>
    "tpu.trace_start"() <{level = 10 : i32, message = "bqk,bkd->bqd"}> : () -> ()
    %cst_93 = arith.constant dense<0.000000e+00> : vector<2x8x8xf32>
    %176 = tpu.matmul %175, %159, %cst_93 {dimension_numbers = #tpu.dot_dimension_numbers<[2], [1], [1], [2], [0, 0, 0, 1, 1, 2], [0], [0]>} : vector<2x8x8xbf16>, vector<2x8x8xbf16>, vector<2x8x8xf32> -> vector<2x8x8xf32>
    "tpu.trace_stop"() : () -> ()
    %177 = vector.shape_cast %176 : vector<2x8x8xf32> to vector<16x8xf32>
    %178 = arith.truncf %177 : vector<16x8xf32> to vector<16x8xbf16>
    %c2_94 = arith.constant 2 : index
    %c0_95 = arith.constant 0 : index
    %c0_96 = arith.constant 0 : index
    %179 = vector.load %arg9[%c2_94, %c0_95, %c0_96] : memref<4x8x32xbf16, #tpu.memory_space<vmem>>, vector<1x8x32xbf16>
    %180 = vector.shape_cast %179 : vector<1x8x32xbf16> to vector<8x32xbf16>
    %cst_97 = arith.constant dense<0.000000e+00> : vector<16x32xf32>
    %181 = tpu.matmul %178, %180, %cst_97 {dimension_numbers = #tpu.dot_dimension_numbers<[1], [0], [0], [1], [0, 0, 1, 1], [], []>} : vector<16x8xbf16>, vector<8x32xbf16>, vector<16x32xf32> -> vector<16x32xf32>
    %182 = arith.addf %132, %181 : vector<16x32xf32>
    %c3 = arith.constant 3 : index
    %c0_98 = arith.constant 0 : index
    %c0_99 = arith.constant 0 : index
    %183 = vector.load %arg3[%c3, %c0_98, %c0_99] : memref<4x32x8xbf16, #tpu.memory_space<vmem>>, vector<1x32x8xbf16>
    %184 = vector.shape_cast %183 : vector<1x32x8xbf16> to vector<32x8xbf16>
    %cst_100 = arith.constant dense<0.000000e+00> : vector<16x8xf32>
    %185 = tpu.matmul %27, %184, %cst_100 {dimension_numbers = #tpu.dot_dimension_numbers<[1], [0], [0], [1], [0, 0, 1, 1], [], []>} : vector<16x32xbf16>, vector<32x8xbf16>, vector<16x8xf32> -> vector<16x8xf32>
    %c3_101 = arith.constant 3 : index
    %c0_102 = arith.constant 0 : index
    %c0_103 = arith.constant 0 : index
    %186 = vector.load %arg4[%c3_101, %c0_102, %c0_103] : memref<4x1x8xf32, #tpu.memory_space<vmem>>, vector<1x1x8xf32>
    %187 = vector.shape_cast %186 : vector<1x1x8xf32> to vector<1x8xf32>
    %188 = vector.broadcast %187 : vector<1x8xf32> to vector<16x8xf32>
    %189 = arith.addf %185, %188 : vector<16x8xf32>
    %190 = vector.shape_cast %189 : vector<16x8xf32> to vector<2x8x8xf32>
    %191 = arith.truncf %190 : vector<2x8x8xf32> to vector<2x8x8xbf16>
    %c3_104 = arith.constant 3 : index
    %c0_105 = arith.constant 0 : index
    %c0_106 = arith.constant 0 : index
    %192 = vector.load %arg5[%c3_104, %c0_105, %c0_106] : memref<4x32x8xbf16, #tpu.memory_space<vmem>>, vector<1x32x8xbf16>
    %193 = vector.shape_cast %192 : vector<1x32x8xbf16> to vector<32x8xbf16>
    %cst_107 = arith.constant dense<0.000000e+00> : vector<16x8xf32>
    %194 = tpu.matmul %27, %193, %cst_107 {dimension_numbers = #tpu.dot_dimension_numbers<[1], [0], [0], [1], [0, 0, 1, 1], [], []>} : vector<16x32xbf16>, vector<32x8xbf16>, vector<16x8xf32> -> vector<16x8xf32>
    %c3_108 = arith.constant 3 : index
    %c0_109 = arith.constant 0 : index
    %c0_110 = arith.constant 0 : index
    %195 = vector.load %arg6[%c3_108, %c0_109, %c0_110] : memref<4x1x8xf32, #tpu.memory_space<vmem>>, vector<1x1x8xf32>
    %196 = vector.shape_cast %195 : vector<1x1x8xf32> to vector<1x8xf32>
    %197 = vector.broadcast %196 : vector<1x8xf32> to vector<16x8xf32>
    %198 = arith.addf %194, %197 : vector<16x8xf32>
    %199 = vector.shape_cast %198 : vector<16x8xf32> to vector<2x8x8xf32>
    %200 = arith.truncf %199 : vector<2x8x8xf32> to vector<2x8x8xbf16>
    %c3_111 = arith.constant 3 : index
    %c0_112 = arith.constant 0 : index
    %c0_113 = arith.constant 0 : index
    %201 = vector.load %arg7[%c3_111, %c0_112, %c0_113] : memref<4x32x8xbf16, #tpu.memory_space<vmem>>, vector<1x32x8xbf16>
    %202 = vector.shape_cast %201 : vector<1x32x8xbf16> to vector<32x8xbf16>
    %cst_114 = arith.constant dense<0.000000e+00> : vector<16x8xf32>
    %203 = tpu.matmul %27, %202, %cst_114 {dimension_numbers = #tpu.dot_dimension_numbers<[1], [0], [0], [1], [0, 0, 1, 1], [], []>} : vector<16x32xbf16>, vector<32x8xbf16>, vector<16x8xf32> -> vector<16x8xf32>
    %c3_115 = arith.constant 3 : index
    %c0_116 = arith.constant 0 : index
    %c0_117 = arith.constant 0 : index
    %204 = vector.load %arg8[%c3_115, %c0_116, %c0_117] : memref<4x1x8xf32, #tpu.memory_space<vmem>>, vector<1x1x8xf32>
    %205 = vector.shape_cast %204 : vector<1x1x8xf32> to vector<1x8xf32>
    %206 = vector.broadcast %205 : vector<1x8xf32> to vector<16x8xf32>
    %207 = arith.addf %203, %206 : vector<16x8xf32>
    %208 = vector.shape_cast %207 : vector<16x8xf32> to vector<2x8x8xf32>
    %209 = arith.truncf %208 : vector<2x8x8xf32> to vector<2x8x8xbf16>
    "tpu.trace_start"() <{level = 10 : i32, message = "bqd,bkd->bqk"}> : () -> ()
    %cst_118 = arith.constant dense<0.000000e+00> : vector<2x8x8xf32>
    %210 = tpu.matmul %191, %200, %cst_118 {dimension_numbers = #tpu.dot_dimension_numbers<[2], [2], [1], [1], [0, 0, 0, 1, 1, 1], [0], [0]>} : vector<2x8x8xbf16>, vector<2x8x8xbf16>, vector<2x8x8xf32> -> vector<2x8x8xf32>
    %cst_119 = arith.constant -1.000000e+30 : f32
    "tpu.trace_stop"() : () -> ()
    %211 = vector.shape_cast %31 : vector<1x8x8xi1> to vector<1x8x8xi1>
    %212 = vector.broadcast %211 : vector<1x8x8xi1> to vector<2x8x8xi1>
    %213 = vector.broadcast %cst_119 : f32 to vector<2x8x8xf32>
    %214 = arith.select %212, %210, %213 : vector<2x8x8xi1>, vector<2x8x8xf32>
    %cst_120 = arith.constant dense<0xFF800000> : vector<2x8xf32>
    %215 = vector.multi_reduction <maximumf>, %214, %cst_120 [2] : vector<2x8x8xf32> to vector<2x8xf32>
    %216 = vector.shape_cast %215 : vector<2x8xf32> to vector<2x8x1xf32>
    %217 = vector.broadcast %216 : vector<2x8x1xf32> to vector<2x8x8xf32>
    %218 = arith.subf %214, %217 : vector<2x8x8xf32>
    %219 = math.exp %218 : vector<2x8x8xf32>
    %cst_121 = arith.constant dense<0.000000e+00> : vector<2x8xf32>
    %220 = vector.multi_reduction <add>, %219, %cst_121 [2] : vector<2x8x8xf32> to vector<2x8xf32>
    %221 = vector.shape_cast %220 : vector<2x8xf32> to vector<2x8x1xf32>
    %222 = tpu.reciprocal %221 {approx = true} : vector<2x8x1xf32> -> vector<2x8x1xf32>
    %223 = vector.broadcast %222 : vector<2x8x1xf32> to vector<2x8x8xf32>
    %224 = arith.mulf %219, %223 : vector<2x8x8xf32>
    %225 = arith.truncf %224 : vector<2x8x8xf32> to vector<2x8x8xbf16>
    "tpu.trace_start"() <{level = 10 : i32, message = "bqk,bkd->bqd"}> : () -> ()
    %cst_122 = arith.constant dense<0.000000e+00> : vector<2x8x8xf32>
    %226 = tpu.matmul %225, %209, %cst_122 {dimension_numbers = #tpu.dot_dimension_numbers<[2], [1], [1], [2], [0, 0, 0, 1, 1, 2], [0], [0]>} : vector<2x8x8xbf16>, vector<2x8x8xbf16>, vector<2x8x8xf32> -> vector<2x8x8xf32>
    "tpu.trace_stop"() : () -> ()
    %227 = vector.shape_cast %226 : vector<2x8x8xf32> to vector<16x8xf32>
    %228 = arith.truncf %227 : vector<16x8xf32> to vector<16x8xbf16>
    %c3_123 = arith.constant 3 : index
    %c0_124 = arith.constant 0 : index
    %c0_125 = arith.constant 0 : index
    %229 = vector.load %arg9[%c3_123, %c0_124, %c0_125] : memref<4x8x32xbf16, #tpu.memory_space<vmem>>, vector<1x8x32xbf16>
    %230 = vector.shape_cast %229 : vector<1x8x32xbf16> to vector<8x32xbf16>
    %cst_126 = arith.constant dense<0.000000e+00> : vector<16x32xf32>
    %231 = tpu.matmul %228, %230, %cst_126 {dimension_numbers = #tpu.dot_dimension_numbers<[1], [0], [0], [1], [0, 0, 1, 1], [], []>} : vector<16x8xbf16>, vector<8x32xbf16>, vector<16x32xf32> -> vector<16x32xf32>
    %232 = arith.addf %182, %231 : vector<16x32xf32>
    %233 = arith.addf %0, %232 : vector<16x32xf32>
    %c0_127 = arith.constant 0 : index
    %c0_128 = arith.constant 0 : index
    %234 = vector.load %arg10[%c0_127, %c0_128] : memref<1x32xf32, #tpu.memory_space<vmem>>, vector<1x32xf32>
    %235 = vector.shape_cast %234 : vector<1x32xf32> to vector<32xf32>
    %236 = vector.shape_cast %235 : vector<32xf32> to vector<1x32xf32>
    %237 = vector.broadcast %236 : vector<1x32xf32> to vector<16x32xf32>
    %238 = arith.addf %233, %237 : vector<16x32xf32>
    %cst_129 = arith.constant dense<0.000000e+00> : vector<16xf32>
    %239 = vector.multi_reduction <add>, %238, %cst_129 [1] : vector<16x32xf32> to vector<16xf32>
    %240 = vector.shape_cast %239 : vector<16xf32> to vector<16x1xf32>
    %cst_130 = arith.constant 3.200000e+01 : f32
    %241 = vector.broadcast %cst_130 : f32 to vector<16x1xf32>
    %242 = arith.divf %240, %241 : vector<16x1xf32>
    %243 = vector.broadcast %242 : vector<16x1xf32> to vector<16x32xf32>
    %244 = arith.subf %238, %243 : vector<16x32xf32>
    %245 = arith.mulf %244, %244 : vector<16x32xf32>
    %cst_131 = arith.constant dense<0.000000e+00> : vector<16xf32>
    %246 = vector.multi_reduction <add>, %245, %cst_131 [1] : vector<16x32xf32> to vector<16xf32>
    %247 = vector.shape_cast %246 : vector<16xf32> to vector<16x1xf32>
    %cst_132 = arith.constant 3.200000e+01 : f32
    %248 = vector.broadcast %cst_132 : f32 to vector<16x1xf32>
    %249 = arith.divf %247, %248 : vector<16x1xf32>
    %cst_133 = arith.constant 9.99999974E-6 : f32
    %250 = vector.broadcast %cst_133 : f32 to vector<16x1xf32>
    %251 = arith.addf %249, %250 : vector<16x1xf32>
    %252 = math.rsqrt %251 : vector<16x1xf32>
    %253 = vector.broadcast %252 : vector<16x1xf32> to vector<16x32xf32>
    %254 = arith.mulf %244, %253 : vector<16x32xf32>
    %c0_134 = arith.constant 0 : index
    %c0_135 = arith.constant 0 : index
    %255 = vector.load %arg11[%c0_134, %c0_135] : memref<1x32xf32, #tpu.memory_space<vmem>>, vector<1x32xf32>
    %256 = vector.shape_cast %255 : vector<1x32xf32> to vector<32xf32>
    %257 = vector.shape_cast %256 : vector<32xf32> to vector<1x32xf32>
    %258 = vector.broadcast %257 : vector<1x32xf32> to vector<16x32xf32>
    %259 = arith.mulf %254, %258 : vector<16x32xf32>
    %c0_136 = arith.constant 0 : index
    %c0_137 = arith.constant 0 : index
    %260 = vector.load %arg12[%c0_136, %c0_137] : memref<1x32xf32, #tpu.memory_space<vmem>>, vector<1x32xf32>
    %261 = vector.shape_cast %260 : vector<1x32xf32> to vector<32xf32>
    %262 = vector.shape_cast %261 : vector<32xf32> to vector<1x32xf32>
    %263 = vector.broadcast %262 : vector<1x32xf32> to vector<16x32xf32>
    %264 = arith.addf %259, %263 : vector<16x32xf32>
    %265 = arith.truncf %264 : vector<16x32xf32> to vector<16x32xbf16>
    %c0_138 = arith.constant 0 : index
    %c0_139 = arith.constant 0 : index
    %266 = vector.load %arg13[%c0_138, %c0_139] : memref<32x128xbf16, #tpu.memory_space<vmem>>, vector<32x128xbf16>
    %cst_140 = arith.constant dense<0.000000e+00> : vector<16x128xf32>
    %267 = tpu.matmul %265, %266, %cst_140 {dimension_numbers = #tpu.dot_dimension_numbers<[1], [0], [0], [1], [0, 0, 1, 1], [], []>} : vector<16x32xbf16>, vector<32x128xbf16>, vector<16x128xf32> -> vector<16x128xf32>
    %c0_141 = arith.constant 0 : index
    %c0_142 = arith.constant 0 : index
    %268 = vector.load %arg14[%c0_141, %c0_142] : memref<1x128xf32, #tpu.memory_space<vmem>>, vector<1x128xf32>
    %269 = vector.shape_cast %268 : vector<1x128xf32> to vector<128xf32>
    %270 = vector.shape_cast %269 : vector<128xf32> to vector<1x128xf32>
    %271 = vector.broadcast %270 : vector<1x128xf32> to vector<16x128xf32>
    %272 = arith.addf %267, %271 : vector<16x128xf32>
    %cst_143 = arith.constant 5.000000e-01 : f32
    %273 = vector.broadcast %cst_143 : f32 to vector<16x128xf32>
    %274 = arith.mulf %273, %272 : vector<16x128xf32>
    %cst_144 = arith.constant 4.471500e-02 : f32
    %275 = vector.broadcast %cst_144 : f32 to vector<16x128xf32>
    %276 = arith.mulf %275, %272 : vector<16x128xf32>
    %277 = arith.mulf %276, %272 : vector<16x128xf32>
    %278 = arith.mulf %277, %272 : vector<16x128xf32>
    %279 = arith.addf %272, %278 : vector<16x128xf32>
    %cst_145 = arith.constant 0.797884583 : f32
    %280 = vector.broadcast %cst_145 : f32 to vector<16x128xf32>
    %281 = arith.mulf %280, %279 : vector<16x128xf32>
    %282 = math.tanh %281 : vector<16x128xf32>
    %cst_146 = arith.constant 1.000000e+00 : f32
    %283 = vector.broadcast %cst_146 : f32 to vector<16x128xf32>
    %284 = arith.addf %283, %282 : vector<16x128xf32>
    %285 = arith.mulf %274, %284 : vector<16x128xf32>
    %286 = arith.truncf %285 : vector<16x128xf32> to vector<16x128xbf16>
    %c0_147 = arith.constant 0 : index
    %c0_148 = arith.constant 0 : index
    %287 = vector.load %arg15[%c0_147, %c0_148] : memref<128x32xbf16, #tpu.memory_space<vmem>>, vector<128x32xbf16>
    %cst_149 = arith.constant dense<0.000000e+00> : vector<16x32xf32>
    %288 = tpu.matmul %286, %287, %cst_149 {dimension_numbers = #tpu.dot_dimension_numbers<[1], [0], [0], [1], [0, 0, 1, 1], [], []>} : vector<16x128xbf16>, vector<128x32xbf16>, vector<16x32xf32> -> vector<16x32xf32>
    %c0_150 = arith.constant 0 : index
    %c0_151 = arith.constant 0 : index
    %289 = vector.load %arg16[%c0_150, %c0_151] : memref<1x32xf32, #tpu.memory_space<vmem>>, vector<1x32xf32>
    %290 = vector.shape_cast %289 : vector<1x32xf32> to vector<32xf32>
    %291 = vector.shape_cast %290 : vector<32xf32> to vector<1x32xf32>
    %292 = vector.broadcast %291 : vector<1x32xf32> to vector<16x32xf32>
    %293 = arith.addf %288, %292 : vector<16x32xf32>
    %294 = arith.addf %238, %293 : vector<16x32xf32>
    %c0_152 = arith.constant 0 : index
    %c0_153 = arith.constant 0 : index
    %295 = vector.load %arg17[%c0_152, %c0_153] : memref<16x32xf32, #tpu.memory_space<vmem>>, vector<16x32xf32>
    tpu.vector_store %arg17[%c0_152, %c0_153], %294 {strides = array<i32>} : memref<16x32xf32, #tpu.memory_space<vmem>>, vector<16x32xf32>,
    return
  }
}

</mosaic_0001>

<bundles_post_ra>
// kernel: block_forward.1
= control target key start
LH: loop header
LB: loop body
LE: loop exit
PB: predicated region body
PF: predicated region fallthrough
CT: control target
= control target key end

     0   :  { %vm59_vm0 = vcmask 261120   ;;  %v2781_v15 = vmov 0.0   ;;  %vm2782_vm1 = vmmov 0   ;;  %vm312_vm2 = vcmask 64512   ;;  %s3334_s0 = inlined_call_operand.vmem [shape: f32[16,32], index: 0, kind: input, shape index: {}, may-alias: {0,17}]   ;;  %s3335_s3 = inlined_call_operand.vmem [shape: bf16[4,32,8], index: 3, kind: input, shape index: {}]   ;;  %s3336_s5 = inlined_call_operand.vmem [shape: bf16[4,32,8], index: 5, kind: input, shape index: {}]   ;;  %s3337_s7 = inlined_call_operand.vmem [shape: bf16[4,32,8], index: 7, kind: input, shape index: {}]   ;;  %s3338_s1 = inlined_call_operand.vmem [shape: f32[1,32], index: 1, kind: input, shape index: {}]   ;;  %s3339_s2 = inlined_call_operand.vmem [shape: f32[1,32], index: 2, kind: input, shape index: {}]   ;;  %s3340_s6 = inlined_call_operand.vmem [shape: f32[4,1,8], index: 6, kind: input, shape index: {}]   ;;  %s3341_s4 = inlined_call_operand.vmem [shape: f32[4,1,8], index: 4, kind: input, shape index: {}]   ;;  %s3342_s8 = inlined_call_operand.vmem [shape: f32[4,1,8], index: 8, kind: input, shape index: {}]   ;;  %s3343_s9 = inlined_call_operand.vmem [shape: bf16[4,8,32], index: 9, kind: input, shape index: {}]   ;;  %s3344_s10 = inlined_call_operand.vmem [shape: f32[1,32], index: 10, kind: input, shape index: {}]   ;;  %s3345_s13 = inlined_call_operand.vmem [shape: bf16[32,128], index: 13, kind: input, shape index: {}]   ;;  %s3346_s11 = inlined_call_operand.vmem [shape: f32[1,32], index: 11, kind: input, shape index: {}]   ;;  %s3347_s12 = inlined_call_operand.vmem [shape: f32[1,32], index: 12, kind: input, shape index: {}]   ;;  %s3348_s15 = inlined_call_operand.vmem [shape: bf16[128,32], index: 15, kind: input, shape index: {}]   ;;  %s3349_s14 = inlined_call_operand.vmem [shape: f32[1,128], index: 14, kind: input, shape index: {}]   ;;  %s3350_s16 = inlined_call_operand.vmem [shape: f32[1,32], index: 16, kind: input, shape index: {}]   ;;  %s3351_s17 = inlined_call_operand.vmem [shape: f32[16,32], index: 17, kind: output, shape index: {}, may-alias: {0,17}]  }
   0x1   :  { %3354 = sst [smem:[#allocation2_spill]] %s3334_s0  ;;  %2455 = vmatprep.subr.bf16.mxu0 %v2781_v15  ;;  %2479 = vmatprep.subr.bf16.mxu1 %v2781_v15  ;;  %v2233_v25 = vld [vmem:[%s3338_s1] ss:$0 sm:$0xff]  ;;  %v2703_v33 = vld [vmem:[%s3336_s5 + $0x8] sm:$0xff]   ;;  %vm436_vm3 = vcmask 1043456  }
   0x2   :  { %3355 = sst [smem:[#allocation3_spill]] %s3335_s3  ;;  %2459 = vmatprep.mubr.msk.bf16.mxu0 %vm2782_vm1, %v2781_v15  ;;  %2481 = vmatprep.mubr.msk.bf16.mxu1 %vm2782_vm1, %v2781_v15  ;;  %v2234_v29 = vld [vmem:[%s3339_s2] ss:$0 sm:$0xff]  ;;  %v2705_v36 = vld [vmem:[%s3337_s7 + $0x8] sm:$0xff]  }
   0x3   :  { %s3356_s26 = sld [smem:[#allocation2_spill]]  ;;  %v2704_v35 = vld [vmem:[%s3336_s5] sm:$0xff]  }
   0x4   :  { %s3357_s30 = sld [smem:[#allocation3_spill]]  ;;  %v2706_v37 = vld [vmem:[%s3337_s7] sm:$0xff]  }
   0x5   :  { %v2239_v42 = vld [vmem:[%s3340_s6] ss:$0 sm:$0xff] }
   0x6   :  { %v2235_v47 = vld [vmem:[%s3341_s4] ss:$0 sm:$0xff] }
   0x7   :  { %v2243_v52 = vld [vmem:[%s3342_s8] ss:$0 sm:$0xff] }
   0x9   :  { %v57_v0 = vld [vmem:[%s3356_s26] sm:$0xff]  ;;  %v58_v1 = vld [vmem:[%s3356_s26 + $0x8] sm:$0xff] }
   0xa   :  { %v60_v2 = vsel %vm59_vm0, %v57_v0, 0.0  ;;  %v63_v3 = vsel %vm59_vm0, %v58_v1, 0.0  ;;  %v2701_v14 = vld [vmem:[%s3357_s30 + $0x8] sm:$0xff]   ;;  %v2702_v16 = vld [vmem:[%s3357_s30] sm:$0xff]  }
   0xb   :  { %61 = vadd.xlane.f32.xlu0 %v60_v2  ;;  %2456 = vmatpush3.bf16.msra.mxu0 %v2701_v14 }
   0xc   :  { %2457 = vmatprep.subr.bf16.mxu0 %v2781_v15 }
   0xf   :  { %64 = vadd.xlane.f32.xlu0 %v63_v3  ;;  %2458 = vmatpush3.bf16.msra.mxu0 %v2702_v16 }
  0x10   :  { %2463 = vmatprep.subr.bf16.mxu0 %v2781_v15 }
  0x94   :  { %v62_v4 = vpop.xlane.xlu0 %61 }
  0x95   :  { %v67_v5 = vmul.f32 0.03125, %v62_v4 }
  0x97   :  { %v69_v6 = vsub.f32 %v57_v0, %v67_v5  ;;  %v106_v5 = vlaneseq }
  0x98   :  { %v65_v7 = vpop.xlane.xlu0 %64 }
  0x99   :  { %v68_v8 = vmul.f32 0.03125, %v65_v7  ;;  %v71_v9 = vmul.f32 %v69_v6, %v69_v6  ;;  %v109_v7 = vand.u32 127, %v106_v5 }
  0x9b   :  { %v70_v10 = vsub.f32 %v58_v1, %v68_v8  ;;  %v73_v11 = vsel %vm59_vm0, %v71_v9, 0.0 }
  0x9c   :  { %74 = vadd.xlane.f32.xlu1 %v73_v11 }
  0x9d   :  { %v72_v12 = vmul.f32 %v70_v10, %v70_v10 }
  0x9f   :  { %v76_v13 = vsel %vm59_vm0, %v72_v12, 0.0 }
  0xa0   :  { %77 = vadd.xlane.f32.xlu1 %v76_v13 }
 0x125   :  { %v75_v17 = vpop.xlane.xlu1 %74 }
 0x126   :  { %v79_v18 = vmul.f32 0.03125, %v75_v17 }
 0x128   :  { %v81_v19 = vadd.f32 1e-05, %v79_v18 }
 0x129   :  { %v78_v20 = vpop.xlane.xlu1 %77 }
 0x12a   :  { %2735 = vrsqrt.f32 %v81_v19  ;;  %v80_v21 = vmul.f32 0.03125, %v78_v20 }
 0x12c   :  { %v82_v22 = vadd.f32 1e-05, %v80_v21 }
 0x12e   :  { %2737 = vrsqrt.f32 %v82_v22 }
 0x137   :  { %v2736_v23 = vpop.eup %2735 }
 0x138   :  { %v85_v24 = vmul.f32 %v2736_v23, %v69_v6  ;;  %v107_v6 = vshrl.u32 %v106_v5, 7 }
 0x13a   :  { %v94_v27 = vmul.f32 %v2233_v25, %v85_v24  ;;  %vm2956_vm4 = vcmp.le.s32.totalorder %v109_v7, %v107_v6 }
 0x13b   :  { %v2738_v26 = vpop.eup %2737 }
 0x13c   :  { %v86_v28 = vmul.f32 %v2738_v26, %v70_v10  ;;  %v103_v31 = vadd.f32 %v2234_v29, %v94_v27 }
 0x13e   :  { %v95_v30 = vmul.f32 %v2233_v25, %v86_v28 }
 0x140   :  { %v104_v32 = vadd.f32 %v2234_v29, %v95_v30 }
 0x142   :  { %v2906_v34 = vpack.c.bf16 %v104_v32, %v103_v31 }
 0x144   :  { %2460 = vmatmul.mubr.msk.bf16.vlgmr.msra.gmra.mxu0 %vm59_vm0, %v2906_v34 }
 0x145   :  { %2464 = vmatpush3.bf16.msra.mxu0 %v2703_v33  ;;  %2467 = vmatprep.mubr.msk.bf16.mxu0 %vm2782_vm1, %v2781_v15 }
 0x146   :  { %2465 = vmatprep.subr.bf16.mxu0 %v2781_v15 }
 0x149   :  { %2466 = vmatpush3.bf16.msra.mxu0 %v2704_v35 }
 0x14a   :  { %2471 = vmatprep.subr.bf16.mxu0 %v2781_v15 }
 0x14c   :  { %2468 = vmatmul.mubr.msk.bf16.vlgmr.msra.gmra.mxu0 %vm59_vm0, %v2906_v34 }
 0x14d   :  { %2472 = vmatpush3.bf16.msra.mxu0 %v2705_v36  ;;  %2475 = vmatprep.mubr.msk.bf16.mxu0 %vm2782_vm1, %v2781_v15 }
 0x14e   :  { %2473 = vmatprep.subr.bf16.mxu0 %v2781_v15 }
 0x151   :  { %2474 = vmatpush3.bf16.msra.mxu0 %v2706_v37  ;;  %v2707_v37 = vld [vmem:[%s3357_s30 + $0x18] sm:$0xff]  }
 0x152   :  { %2485 = vmatprep.subr.bf16.mxu0 %v2781_v15 }
 0x154   :  { %2476 = vmatmul.mubr.msk.bf16.vlgmr.msra.gmra.mxu0 %vm59_vm0, %v2906_v34 }
 0x155   :  { %2487 = vmatprep.mubr.msk.bf16.mxu0 %vm2782_vm1, %v2781_v15 }
 0x204   :  { %v171_v38 = vpop.f32.mrf.mxu0 }
 0x205   :  { %v172_v53 = vadd.f32 %v2235_v47, %v171_v38 }
 0x206   :  { %v2461_v39 = vpop.f32.mrf.mxu0 }
 0x207   :  { %v178_v59 = vpack.c.bf16 %v172_v53, %v172_v53 }
 0x208   :  { %v174_v40 = vpop.f32.mrf.mxu0 }
 0x209   :  { %v175_v60 = vadd.f32 %v2235_v47, %v174_v40 }
 0x20a   :  { %v2462_v41 = vpop.f32.mrf.mxu0 }
 0x20b   :  { %v179_v2 = vpack.c.bf16 %v175_v60, %v175_v60  ;;  %v2708_v41 = vld [vmem:[%s3357_s30 + $0x10] sm:$0xff]  }
 0x20c   :  { %v237_v43 = vpop.f32.mrf.mxu0 }
 0x20d   :  { %v238_v44 = vadd.f32 %v2239_v42, %v237_v43 }
 0x20e   :  { %v2469_v45 = vpop.f32.mrf.mxu0 }
 0x20f   :  { %v244_v46 = vpack.c.bf16 %v238_v44, %v238_v44  ;;  %v2710_v44 = vld [vmem:[%s3336_s5 + $0x10] sm:$0xff]   ;;  %v2711_v45 = vld [vmem:[%s3337_s7 + $0x18] sm:$0xff]  }
 0x210   :  { %v240_v48 = vpop.f32.mrf.mxu0 }
 0x211   :  { %v241_v49 = vadd.f32 %v2239_v42, %v240_v48  ;;  %v317_v50 = vsel %vm312_vm2, %v244_v46, 0  ;;  %v2709_v42 = vld [vmem:[%s3336_s5 + $0x18] sm:$0xff]   ;;  %v2712_v46 = vld [vmem:[%s3337_s7 + $0x10] sm:$0xff]  }
 0x212   :  { %v2470_v51 = vpop.f32.mrf.mxu0  ;;  %2480 = vmatpush3.bf16.xpose.msra.mxu1 %v317_v50 }
 0x213   :  { %v245_v54 = vpack.c.bf16 %v241_v49, %v241_v49  ;;  %2491 = vmatprep.subr.bf16.mxu1 %v2781_v15 }
 0x214   :  { %v303_v55 = vpop.f32.mrf.mxu0 }
 0x215   :  { %v363_v56 = vsel %vm312_vm2, %v245_v54, 0  ;;  %v304_v57 = vadd.f32 %v2243_v52, %v303_v55 }
 0x216   :  { %v2477_v58 = vpop.f32.mrf.mxu0  ;;  %2486 = vmatpush3.bf16.xpose.msra.mxu0 %v363_v56 }
 0x217   :  { %v310_v61 = vpack.c.bf16 %v304_v57, %v304_v57  ;;  %2497 = vmatprep.subr.bf16.mxu0 %v2781_v15  ;;  %v2265_v58 = vld [vmem:[%s3340_s6 + $0x1] ss:$0 sm:$0xff] }
 0x218   :  { %v306_v62 = vpop.f32.mrf.mxu0 }
 0x219   :  { %v438_v63 = vsel %vm436_vm3, %v310_v61, 0  ;;  %v307_v0 = vadd.f32 %v2243_v52, %v306_v62  ;;  %2482 = vmatmul.mubr.msk.bf16.vlgmr.msra.gmra.mxu1 %vm312_vm2, %v178_v59 }
 0x21a   :  { %v2478_v1 = vpop.f32.mrf.mxu0  ;;  %2492 = vmatpush3.bf16.msra.mxu1 %v438_v63  ;;  %2493 = vmatprep.mubr.msk.bf16.mxu1 %vm2782_vm1, %v2781_v15 }
 0x21b   :  { %v311_v3 = vpack.c.bf16 %v307_v0, %v307_v0  ;;  %2503 = vmatprep.subr.bf16.mxu1 %v2781_v15  ;;  %v2274_v0 = vld [vmem:[%s3342_s8 + $0x1] ss:$0 sm:$0xff] }
 0x21d   :  { %v484_v4 = vsel %vm436_vm3, %v311_v3, 0  ;;  %2488 = vmatmul.mubr.msk.bf16.vlgmr.msra.gmra.mxu0 %vm312_vm2, %v179_v2  ;;  %v2256_v2 = vld [vmem:[%s3341_s4 + $0x1] ss:$0 sm:$0xff] }
 0x21e   :  { %2498 = vmatpush3.bf16.msra.mxu0 %v484_v4  ;;  %2499 = vmatprep.mubr.msk.bf16.mxu0 %vm2782_vm1, %v2781_v15 }
 0x21f   :  { %2511 = vmatprep.subr.bf16.mxu0 %v2781_v15 }
 0x2d9   :  { %v353_v9 = vpop.f32.mrf.mxu1 }
 0x2da   :  { %v407_v10 = vsel %vm2956_vm4, %v353_v9, -1e+30 }
 0x2db   :  { %v2483_v11 = vpop.f32.mrf.mxu1  ;;  %v409_v12 = vsel %vm312_vm2, %v407_v10, -inf }
 0x2dc   :  { %410 = vmax.xlane.f32.xlu1 %v409_v12 }
 0x2dd   :  { %v356_v13 = vpop.f32.mrf.mxu1  ;;  %v399_v14 = vpop.f32.mrf.mxu0 }
 0x2de   :  { %v408_v16 = vsel %vm2956_vm4, %v399_v14, -1e+30 }
 0x2df   :  { %v2484_v17 = vpop.f32.mrf.mxu1  ;;  %v2489_v18 = vpop.f32.mrf.mxu0  ;;  %v412_v19 = vsel %vm312_vm2, %v408_v16, -inf }
 0x2e0   :  { %413 = vmax.xlane.f32.xlu0 %v412_v19 }
 0x2e1   :  { %v402_v20 = vpop.f32.mrf.mxu0 }
 0x2e3   :  { %v2490_v21 = vpop.f32.mrf.mxu0 }
 0x365   :  { %v411_v22 = vpop.xlane.xlu1 %410 }
 0x366   :  { %v415_v23 = vsub.f32 %v407_v10, %v411_v22 }
 0x368   :  { %v417_v24 = vmul.f32 1.442695, %v415_v23 }
 0x369   :  { %v414_v25 = vpop.xlane.xlu0 %413 }
 0x36a   :  { %2739 = vpow2.f32 %v417_v24  ;;  %v416_v26 = vsub.f32 %v408_v16, %v414_v25 }
 0x36c   :  { %v419_v27 = vmul.f32 1.442695, %v416_v26 }
 0x36e   :  { %2741 = vpow2.f32 %v419_v27 }
 0x377   :  { %v2740_v28 = vpop.eup %2739 }
 0x378   :  { %v421_v29 = vsel %vm312_vm2, %v2740_v28, 0.0 }
 0x379   :  { %422 = vadd.xlane.f32.xlu1 %v421_v29 }
 0x37b   :  { %v2742_v30 = vpop.eup %2741 }
 0x37c   :  { %v424_v31 = vsel %vm312_vm2, %v2742_v30, 0.0 }
 0x37d   :  { %425 = vadd.xlane.f32.xlu0 %v424_v31 }
 0x402   :  { %v423_v32 = vpop.xlane.xlu1 %422 }
 0x403   :  { %2743 = vrcp.f32 %v423_v32 }
 0x406   :  { %v426_v33 = vpop.xlane.xlu0 %425 }
 0x407   :  { %2745 = vrcp.f32 %v426_v33 }
 0x410   :  { %v2744_v35 = vpop.eup %2743 }
 0x411   :  { %v429_v36 = vmul.f32 %v2744_v35, %v2740_v28 }
 0x413   :  { %v431_v38 = vpack.c.bf16 %v429_v36, %v429_v36 }
 0x414   :  { %v2746_v39 = vpop.eup %2745 }
 0x415   :  { %2494 = vmatmul.mubr.msk.bf16.vlgmr.msra.gmra.mxu1 %vm312_vm2, %v431_v38  ;;  %v430_v40 = vmul.f32 %v2746_v39, %v2742_v30 }
 0x416   :  { %2504 = vmatpush3.bf16.msra.mxu1 %v2707_v37  ;;  %2507 = vmatprep.mubr.msk.bf16.mxu1 %vm2782_vm1, %v2781_v15 }
 0x417   :  { %v432_v43 = vpack.c.bf16 %v430_v40, %v430_v40  ;;  %2505 = vmatprep.subr.bf16.mxu1 %v2781_v15 }
 0x419   :  { %2500 = vmatmul.mubr.msk.bf16.vlgmr.msra.gmra.mxu0 %vm312_vm2, %v432_v43 }
 0x41a   :  { %2506 = vmatpush3.bf16.msra.mxu1 %v2708_v41  ;;  %2512 = vmatpush3.bf16.msra.mxu0 %v2709_v42 }
 0x41b   :  { %2513 = vmatprep.subr.bf16.mxu0 %v2781_v15  ;;  %2519 = vmatprep.subr.bf16.mxu1 %v2781_v15 }
 0x41c   :  { %2515 = vmatprep.mubr.msk.bf16.mxu0 %vm2782_vm1, %v2781_v15 }
 0x41d   :  { %2508 = vmatmul.mubr.msk.bf16.vlgmr.msra.gmra.mxu1 %vm59_vm0, %v2906_v34 }
 0x41e   :  { %2514 = vmatpush3.bf16.msra.mxu0 %v2710_v44  ;;  %2520 = vmatpush3.bf16.msra.mxu1 %v2711_v45 }
 0x41f   :  { %2521 = vmatprep.subr.bf16.mxu1 %v2781_v15  ;;  %2523 = vmatprep.mubr.msk.bf16.mxu1 %vm2782_vm1, %v2781_v15 }
 0x420   :  { %2527 = vmatprep.subr.bf16.mxu0 %v2781_v15 }
 0x421   :  { %2516 = vmatmul.mubr.msk.bf16.vlgmr.msra.gmra.mxu0 %vm59_vm0, %v2906_v34 }
 0x422   :  { %2522 = vmatpush3.bf16.msra.mxu1 %v2712_v46  ;;  %2529 = vmatprep.mubr.msk.bf16.mxu0 %vm2782_vm1, %v2781_v15 }
 0x423   :  { %2533 = vmatprep.subr.bf16.mxu1 %v2781_v15 }
 0x425   :  { %2524 = vmatmul.mubr.msk.bf16.vlgmr.msra.gmra.mxu1 %vm59_vm0, %v2906_v34 }
 0x426   :  { %2535 = vmatprep.mubr.msk.bf16.mxu1 %vm2782_vm1, %v2781_v15 }
 0x4d5   :  { %v3010_v47 = vpop.f32.mrf.mxu1 }
 0x4d7   :  { %v2495_v48 = vpop.f32.mrf.mxu1 }
 0x4d9   :  { %v477_v49 = vpop.f32.mrf.mxu1  ;;  %v3012_v50 = vpop.f32.mrf.mxu0 }
 0x4da   :  { %v526_v51 = vpack.c.bf16 %v3012_v50, %v3010_v47  ;;  %v2282_v47 = vld [vmem:[%s3343_s9 + $0x4] sm:$0xf] }
 0x4db   :  { %v2496_v52 = vpop.f32.mrf.mxu1  ;;  %v2501_v53 = vpop.f32.mrf.mxu0  ;;  %v949_v50 = vsel %vm436_vm3, %v2282_v47, 0 }
 0x4dd   :  { %v523_v54 = vpop.f32.mrf.mxu0  ;;  %v587_v55 = vpop.f32.mrf.mxu1 }
 0x4de   :  { %v588_v11 = vadd.f32 %v2256_v2, %v587_v55 }
 0x4df   :  { %v2502_v56 = vpop.f32.mrf.mxu0  ;;  %v2509_v57 = vpop.f32.mrf.mxu1 }
 0x4e0   :  { %v594_v19 = vpack.c.bf16 %v588_v11, %v588_v11  ;;  %v527_v57 = vld [vmem:[%s3343_s9] sm:$0xf]  ;;  %v2717_v11 = vld [vmem:[%s3337_s7 + $0x28] sm:$0xff]  }
 0x4e1   :  { %v590_v59 = vpop.f32.mrf.mxu1  ;;  %v655_v60 = vpop.f32.mrf.mxu0 }
 0x4e2   :  { %v656_v61 = vadd.f32 %v2265_v58, %v655_v60  ;;  %v591_v20 = vadd.f32 %v2256_v2, %v590_v59  ;;  %v996_v60 = vsel %vm436_vm3, %v527_v57, 0  ;;  %v2715_v2 = vld [vmem:[%s3357_s30 + $0x28] sm:$0xff]  }
 0x4e3   :  { %v2510_v62 = vpop.f32.mrf.mxu1  ;;  %v2517_v63 = vpop.f32.mrf.mxu0 }
 0x4e4   :  { %v662_v1 = vpack.c.bf16 %v656_v61, %v656_v61  ;;  %v595_v23 = vpack.c.bf16 %v591_v20, %v591_v20  ;;  %v2713_v61 = vld [vmem:[%s3336_s5 + $0x28] sm:$0xff]   ;;  %v2714_v62 = vld [vmem:[%s3336_s5 + $0x20] sm:$0xff]  }
 0x4e5   :  { %v658_v3 = vpop.f32.mrf.mxu0  ;;  %v723_v4 = vpop.f32.mrf.mxu1 }
 0x4e6   :  { %v736_v5 = vsel %vm312_vm2, %v662_v1, 0  ;;  %v659_v6 = vadd.f32 %v2265_v58, %v658_v3  ;;  %v724_v7 = vadd.f32 %v2274_v0, %v723_v4 }
 0x4e7   :  { %v2518_v9 = vpop.f32.mrf.mxu0  ;;  %v2525_v10 = vpop.f32.mrf.mxu1  ;;  %2528 = vmatpush3.bf16.xpose.msra.mxu0 %v736_v5 }
 0x4e8   :  { %v663_v12 = vpack.c.bf16 %v659_v6, %v659_v6  ;;  %2539 = vmatprep.subr.bf16.mxu0 %v2781_v15  ;;  %v730_v16 = vpack.c.bf16 %v724_v7, %v724_v7  ;;  %v2716_v7 = vld [vmem:[%s3357_s30 + $0x20] sm:$0xff]  }
 0x4e9   :  { %v726_v13 = vpop.f32.mrf.mxu1 }
 0x4ea   :  { %v782_v14 = vsel %vm312_vm2, %v663_v12, 0  ;;  %v727_v17 = vadd.f32 %v2274_v0, %v726_v13  ;;  %v854_v21 = vsel %vm436_vm3, %v730_v16, 0 }
 0x4eb   :  { %v2526_v18 = vpop.f32.mrf.mxu1  ;;  %2534 = vmatpush3.bf16.xpose.msra.mxu1 %v782_v14  ;;  %v2718_v14 = vld [vmem:[%s3337_s7 + $0x20] sm:$0xff]  }
 0x4ec   :  { %2545 = vmatprep.subr.bf16.mxu1 %v2781_v15  ;;  %v731_v22 = vpack.c.bf16 %v727_v17, %v727_v17  ;;  %v2299_v17 = vld [vmem:[%s3340_s6 + $0x2] ss:$0 sm:$0xff] }
 0x4ee   :  { %2530 = vmatmul.mubr.msk.bf16.vlgmr.msra.gmra.mxu0 %vm312_vm2, %v594_v19  ;;  %v900_v24 = vsel %vm436_vm3, %v731_v22, 0 }
 0x4ef   :  { %2540 = vmatpush3.bf16.msra.mxu0 %v854_v21  ;;  %2541 = vmatprep.mubr.msk.bf16.mxu0 %vm2782_vm1, %v2781_v15 }
 0x4f0   :  { %2551 = vmatprep.subr.bf16.mxu0 %v2781_v15 }
 0x4f2   :  { %2536 = vmatmul.mubr.msk.bf16.vlgmr.msra.gmra.mxu1 %vm312_vm2, %v595_v23 }
 0x4f3   :  { %2546 = vmatpush3.bf16.msra.mxu1 %v900_v24  ;;  %2547 = vmatprep.mubr.msk.bf16.mxu1 %vm2782_vm1, %v2781_v15 }
 0x4f4   :  { %2557 = vmatprep.subr.bf16.mxu1 %v2781_v15 }
 0x5ae   :  { %v772_v25 = vpop.f32.mrf.mxu0 }
 0x5af   :  { %v824_v26 = vsel %vm2956_vm4, %v772_v25, -1e+30 }
 0x5b0   :  { %v2531_v27 = vpop.f32.mrf.mxu0  ;;  %v826_v28 = vsel %vm312_vm2, %v824_v26, -inf }
 0x5b1   :  { %827 = vmax.xlane.f32.xlu0 %v826_v28 }
 0x5b2   :  { %v775_v29 = vpop.f32.mrf.mxu0  ;;  %v818_v30 = vpop.f32.mrf.mxu1 }
 0x5b3   :  { %v825_v31 = vsel %vm2956_vm4, %v818_v30, -1e+30 }
 0x5b4   :  { %v2532_v32 = vpop.f32.mrf.mxu0  ;;  %v2537_v33 = vpop.f32.mrf.mxu1  ;;  %v829_v35 = vsel %vm312_vm2, %v825_v31, -inf }
 0x5b5   :  { %830 = vmax.xlane.f32.xlu1 %v829_v35  ;;  %v2290_v32 = vld [vmem:[%s3341_s4 + $0x2] ss:$0 sm:$0xff] }
 0x5b6   :  { %v821_v36 = vpop.f32.mrf.mxu1 }
 0x5b8   :  { %v2538_v37 = vpop.f32.mrf.mxu1 }
 0x63a   :  { %v828_v38 = vpop.xlane.xlu0 %827 }
 0x63b   :  { %v832_v39 = vsub.f32 %v824_v26, %v828_v38 }
 0x63d   :  { %v834_v40 = vmul.f32 1.442695, %v832_v39 }
 0x63e   :  { %v831_v41 = vpop.xlane.xlu1 %830 }
 0x63f   :  { %2747 = vpow2.f32 %v834_v40  ;;  %v833_v42 = vsub.f32 %v825_v31, %v831_v41  ;;  %v2308_v41 = vld [vmem:[%s3342_s8 + $0x2] ss:$0 sm:$0xff] }
 0x641   :  { %v836_v43 = vmul.f32 1.442695, %v833_v42 }
 0x643   :  { %2749 = vpow2.f32 %v836_v43 }
 0x64c   :  { %v2748_v44 = vpop.eup %2747 }
 0x64d   :  { %v838_v45 = vsel %vm312_vm2, %v2748_v44, 0.0 }
 0x64e   :  { %839 = vadd.xlane.f32.xlu0 %v838_v45 }
 0x650   :  { %v2750_v46 = vpop.eup %2749 }
 0x651   :  { %v841_v48 = vsel %vm312_vm2, %v2750_v46, 0.0 }
 0x652   :  { %842 = vadd.xlane.f32.xlu1 %v841_v48 }
 0x6d7   :  { %v840_v49 = vpop.xlane.xlu0 %839 }
 0x6d8   :  { %2751 = vrcp.f32 %v840_v49 }
 0x6db   :  { %v843_v52 = vpop.xlane.xlu1 %842 }
 0x6dc   :  { %2753 = vrcp.f32 %v843_v52 }
 0x6e5   :  { %v2752_v53 = vpop.eup %2751 }
 0x6e6   :  { %v846_v54 = vmul.f32 %v2752_v53, %v2748_v44 }
 0x6e8   :  { %v848_v55 = vpack.c.bf16 %v846_v54, %v846_v54 }
 0x6e9   :  { %v2754_v56 = vpop.eup %2753 }
 0x6ea   :  { %2542 = vmatmul.mubr.msk.bf16.vlgmr.msra.gmra.mxu0 %vm312_vm2, %v848_v55  ;;  %v847_v58 = vmul.f32 %v2754_v56, %v2750_v46 }
 0x6eb   :  { %2553 = vmatprep.mubr.msk.bf16.mxu0 %vm2782_vm1, %v2781_v15  ;;  %2552 = vmatpush3.bf16.msra.mxu0 %v949_v50 }
 0x6ec   :  { %v849_v59 = vpack.c.bf16 %v847_v58, %v847_v58  ;;  %2563 = vmatprep.subr.bf16.mxu0 %v2781_v15 }
 0x6ee   :  { %2548 = vmatmul.mubr.msk.bf16.vlgmr.msra.gmra.mxu1 %vm312_vm2, %v849_v59 }
 0x6ef   :  { %2558 = vmatpush3.bf16.msra.mxu1 %v996_v60  ;;  %2559 = vmatprep.mubr.msk.bf16.mxu1 %vm2782_vm1, %v2781_v15 }
 0x6f0   :  { %2571 = vmatprep.subr.bf16.mxu1 %v2781_v15 }
 0x6f6   :  { %2560 = vmatmul.mubr.msk.bf16.vlgmr.msra.gmra.mxu1 %vm312_vm2, %v526_v51 }
 0x6f7   :  { %2572 = vmatpush3.bf16.msra.mxu1 %v2713_v61  ;;  %2575 = vmatprep.mubr.msk.bf16.mxu1 %vm2782_vm1, %v2781_v15 }
 0x6f8   :  { %2573 = vmatprep.subr.bf16.mxu1 %v2781_v15 }
 0x6fb   :  { %2574 = vmatpush3.bf16.msra.mxu1 %v2714_v62 }
 0x6fc   :  { %2587 = vmatprep.subr.bf16.mxu1 %v2781_v15 }
 0x6fe   :  { %2576 = vmatmul.mubr.msk.bf16.vlgmr.msra.gmra.mxu1 %vm59_vm0, %v2906_v34 }
 0x6ff   :  { %2589 = vmatprep.mubr.msk.bf16.mxu1 %vm2782_vm1, %v2781_v15 }
 0x7aa   :  { %v890_v51 = vpop.f32.mrf.mxu0 }
 0x7ac   :  { %v2543_v63 = vpop.f32.mrf.mxu0 }
 0x7ae   :  { %v893_v0 = vpop.f32.mrf.mxu0  ;;  %v936_v1 = vpop.f32.mrf.mxu1 }
 0x7af   :  { %v942_v3 = vpack.c.bf16 %v936_v1, %v890_v51 }
 0x7b0   :  { %v2544_v4 = vpop.f32.mrf.mxu0  ;;  %v2549_v5 = vpop.f32.mrf.mxu1 }
 0x7b1   :  { %2554 = vmatmul.mubr.msk.bf16.vlgmr.msra.gmra.mxu0 %vm312_vm2, %v942_v3 }
 0x7b2   :  { %v939_v6 = vpop.f32.mrf.mxu1  ;;  %2564 = vmatpush3.bf16.msra.mxu0 %v2715_v2  ;;  %2567 = vmatprep.mubr.msk.bf16.mxu0 %vm2782_vm1, %v2781_v15 }
 0x7b3   :  { %2565 = vmatprep.subr.bf16.mxu0 %v2781_v15 }
 0x7b4   :  { %v2550_v9 = vpop.f32.mrf.mxu1 }
 0x7b6   :  { %v3091_v10 = vpop.f32.mrf.mxu1  ;;  %2566 = vmatpush3.bf16.msra.mxu0 %v2716_v7 }
 0x7b7   :  { %2579 = vmatprep.subr.bf16.mxu0 %v2781_v15 }
 0x7b8   :  { %v2561_v12 = vpop.f32.mrf.mxu1 }
 0x7b9   :  { %2568 = vmatmul.mubr.msk.bf16.vlgmr.msra.gmra.mxu0 %vm59_vm0, %v2906_v34 }
 0x7ba   :  { %v3099_v13 = vpop.f32.mrf.mxu1  ;;  %2580 = vmatpush3.bf16.msra.mxu0 %v2717_v11  ;;  %2583 = vmatprep.mubr.msk.bf16.mxu0 %vm2782_vm1, %v2781_v15 }
 0x7bb   :  { %2581 = vmatprep.subr.bf16.mxu0 %v2781_v15 }
 0x7bc   :  { %v2562_v16 = vpop.f32.mrf.mxu1 }
 0x7be   :  { %v1166_v18 = vpop.f32.mrf.mxu1  ;;  %2582 = vmatpush3.bf16.msra.mxu0 %v2718_v14 }
 0x7bf   :  { %v1167_v19 = vadd.f32 %v2299_v17, %v1166_v18  ;;  %2593 = vmatprep.subr.bf16.mxu0 %v2781_v15 }
 0x7c0   :  { %v2577_v20 = vpop.f32.mrf.mxu1 }
 0x7c1   :  { %v1173_v21 = vpack.c.bf16 %v1167_v19, %v1167_v19  ;;  %2584 = vmatmul.mubr.msk.bf16.vlgmr.msra.gmra.mxu0 %vm59_vm0, %v2906_v34 }
 0x7c2   :  { %v1169_v22 = vpop.f32.mrf.mxu1  ;;  %2595 = vmatprep.mubr.msk.bf16.mxu0 %vm2782_vm1, %v2781_v15 }
 0x7c3   :  { %v1247_v23 = vsel %vm312_vm2, %v1173_v21, 0  ;;  %v1170_v24 = vadd.f32 %v2299_v17, %v1169_v22  ;;  %v2719_v22 = vld [vmem:[%s3357_s30 + $0x38] sm:$0xff]  }
 0x7c4   :  { %v2578_v25 = vpop.f32.mrf.mxu1  ;;  %2588 = vmatpush3.bf16.xpose.msra.mxu1 %v1247_v23 }
 0x7c5   :  { %v1174_v26 = vpack.c.bf16 %v1170_v24, %v1170_v24  ;;  %2599 = vmatprep.subr.bf16.mxu1 %v2781_v15  ;;  %v2720_v24 = vld [vmem:[%s3357_s30 + $0x30] sm:$0xff]   ;;  %v2721_v25 = vld [vmem:[%s3337_s7 + $0x38] sm:$0xff]  }
 0x7c7   :  { %v1293_v27 = vsel %vm312_vm2, %v1174_v26, 0  ;;  %v2722_v26 = vld [vmem:[%s3337_s7 + $0x30] sm:$0xff]  }
 0x7c8   :  { %2594 = vmatpush3.bf16.xpose.msra.mxu0 %v1293_v27  ;;  %v2316_v27 = vld [vmem:[%s3343_s9 + $0x8] sm:$0xf] }
 0x7c9   :  { %2605 = vmatprep.subr.bf16.mxu0 %v2781_v15 }
 0x871   :  { %v3119_v28 = vpop.f32.mrf.mxu0 }
 0x873   :  { %v2555_v29 = vpop.f32.mrf.mxu0 }
 0x874   :  { %v1460_v29 = vsel %vm436_vm3, %v2316_v27, 0 }
 0x875   :  { %v3121_v30 = vpop.f32.mrf.mxu0 }
 0x877   :  { %v2556_v31 = vpop.f32.mrf.mxu0 }
 0x879   :  { %v1098_v33 = vpop.f32.mrf.mxu0 }
 0x87a   :  { %v1099_v35 = vadd.f32 %v2290_v32, %v1098_v33 }
 0x87b   :  { %v2569_v36 = vpop.f32.mrf.mxu0 }
 0x87c   :  { %v1105_v37 = vpack.c.bf16 %v1099_v35, %v1099_v35  ;;  %v2723_v36 = vld [vmem:[%s3336_s5 + $0x38] sm:$0xff]  }
 0x87d   :  { %v1101_v38 = vpop.f32.mrf.mxu0 }
 0x87e   :  { %v1102_v39 = vadd.f32 %v2290_v32, %v1101_v38  ;;  %2590 = vmatmul.mubr.msk.bf16.vlgmr.msra.gmra.mxu1 %vm312_vm2, %v1105_v37 }
 0x87f   :  { %v2570_v40 = vpop.f32.mrf.mxu0  ;;  %2601 = vmatprep.mubr.msk.bf16.mxu1 %vm2782_vm1, %v2781_v15 }
 0x880   :  { %v1106_v42 = vpack.c.bf16 %v1102_v39, %v1102_v39 }
 0x881   :  { %v1234_v43 = vpop.f32.mrf.mxu0 }
 0x882   :  { %v1235_v44 = vadd.f32 %v2308_v41, %v1234_v43  ;;  %2596 = vmatmul.mubr.msk.bf16.vlgmr.msra.gmra.mxu0 %vm312_vm2, %v1106_v42 }
 0x883   :  { %v2585_v45 = vpop.f32.mrf.mxu0  ;;  %2607 = vmatprep.mubr.msk.bf16.mxu0 %vm2782_vm1, %v2781_v15 }
 0x884   :  { %v1241_v46 = vpack.c.bf16 %v1235_v44, %v1235_v44 }
 0x885   :  { %v1237_v48 = vpop.f32.mrf.mxu0 }
 0x886   :  { %v1365_v49 = vsel %vm436_vm3, %v1241_v46, 0  ;;  %v1238_v52 = vadd.f32 %v2308_v41, %v1237_v48  ;;  %v2724_v41 = vld [vmem:[%s3336_s5 + $0x30] sm:$0xff]  }
 0x887   :  { %v2586_v53 = vpop.f32.mrf.mxu0  ;;  %2600 = vmatpush3.bf16.msra.mxu1 %v1365_v49 }
 0x888   :  { %v1242_v54 = vpack.c.bf16 %v1238_v52, %v1238_v52  ;;  %2611 = vmatprep.subr.bf16.mxu1 %v2781_v15 }
 0x88a   :  { %v1411_v55 = vsel %vm436_vm3, %v1242_v54, 0  ;;  %v1033_v54 = vadd.f32 %v3091_v10, %v3119_v28  ;;  %v2341_v10 = vld [vmem:[%s3342_s8 + $0x3] ss:$0 sm:$0xff] }
 0x88b   :  { %2606 = vmatpush3.bf16.msra.mxu0 %v1411_v55 }
 0x88c   :  { %2617 = vmatprep.subr.bf16.mxu0 %v2781_v15 }
 0x93e   :  { %v1283_v56 = vpop.f32.mrf.mxu1 }
 0x93f   :  { %v1335_v57 = vsel %vm2956_vm4, %v1283_v56, -1e+30 }
 0x940   :  { %v2591_v58 = vpop.f32.mrf.mxu1  ;;  %v1337_v59 = vsel %vm312_vm2, %v1335_v57, -inf }
 0x941   :  { %1338 = vmax.xlane.f32.xlu0 %v1337_v59  ;;  %v1036_v58 = vadd.f32 %v3099_v13, %v3121_v30  ;;  %v2323_v13 = vld [vmem:[%s3341_s4 + $0x3] ss:$0 sm:$0xff] }
 0x942   :  { %v1286_v60 = vpop.f32.mrf.mxu1  ;;  %v1329_v61 = vpop.f32.mrf.mxu0 }
 0x943   :  { %v1336_v62 = vsel %vm2956_vm4, %v1329_v61, -1e+30  ;;  %v2332_v61 = vld [vmem:[%s3340_s6 + $0x3] ss:$0 sm:$0xff] }
 0x944   :  { %v2592_v47 = vpop.f32.mrf.mxu1  ;;  %v2597_v50 = vpop.f32.mrf.mxu0  ;;  %v1340_v51 = vsel %vm312_vm2, %v1336_v62, -inf }
 0x945   :  { %1341 = vmax.xlane.f32.xlu1 %v1340_v51 }
 0x946   :  { %v1332_v63 = vpop.f32.mrf.mxu0 }
 0x948   :  { %v2598_v0 = vpop.f32.mrf.mxu0 }
 0x9ca   :  { %v1339_v1 = vpop.xlane.xlu0 %1338 }
 0x9cb   :  { %v1343_v2 = vsub.f32 %v1335_v57, %v1339_v1 }
 0x9cd   :  { %v1345_v3 = vmul.f32 1.442695, %v1343_v2 }
 0x9ce   :  { %v1342_v4 = vpop.xlane.xlu1 %1341 }
 0x9cf   :  { %2755 = vpow2.f32 %v1345_v3  ;;  %v1344_v5 = vsub.f32 %v1336_v62, %v1342_v4 }
 0x9d1   :  { %v1347_v6 = vmul.f32 1.442695, %v1344_v5 }
 0x9d3   :  { %2757 = vpow2.f32 %v1347_v6 }
 0x9dc   :  { %v2756_v7 = vpop.eup %2755 }
 0x9dd   :  { %v1349_v9 = vsel %vm312_vm2, %v2756_v7, 0.0 }
 0x9de   :  { %1350 = vadd.xlane.f32.xlu0 %v1349_v9 }
 0x9e0   :  { %v2758_v11 = vpop.eup %2757 }
 0x9e1   :  { %v1352_v12 = vsel %vm312_vm2, %v2758_v11, 0.0 }
 0x9e2   :  { %1353 = vadd.xlane.f32.xlu1 %v1352_v12 }
 0xa67   :  { %v1351_v14 = vpop.xlane.xlu0 %1350 }
 0xa68   :  { %2759 = vrcp.f32 %v1351_v14 }
 0xa6b   :  { %v1354_v16 = vpop.xlane.xlu1 %1353 }
 0xa6c   :  { %2761 = vrcp.f32 %v1354_v16 }
 0xa75   :  { %v2760_v17 = vpop.eup %2759 }
 0xa76   :  { %v1357_v18 = vmul.f32 %v2760_v17, %v2756_v7 }
 0xa78   :  { %v1359_v19 = vpack.c.bf16 %v1357_v18, %v1357_v18 }
 0xa79   :  { %v2762_v20 = vpop.eup %2761 }
 0xa7a   :  { %2602 = vmatmul.mubr.msk.bf16.vlgmr.msra.gmra.mxu1 %vm312_vm2, %v1359_v19  ;;  %v1358_v21 = vmul.f32 %v2762_v20, %v2758_v11 }
 0xa7b   :  { %2613 = vmatprep.mubr.msk.bf16.mxu1 %vm2782_vm1, %v2781_v15  ;;  %2612 = vmatpush3.bf16.msra.mxu1 %v1460_v29 }
 0xa7c   :  { %v1360_v23 = vpack.c.bf16 %v1358_v21, %v1358_v21  ;;  %2625 = vmatprep.subr.bf16.mxu1 %v2781_v15 }
 0xa7e   :  { %2608 = vmatmul.mubr.msk.bf16.vlgmr.msra.gmra.mxu0 %vm312_vm2, %v1360_v23 }
 0xa7f   :  { %2618 = vmatpush3.bf16.msra.mxu0 %v2719_v22  ;;  %2621 = vmatprep.mubr.msk.bf16.mxu0 %vm2782_vm1, %v2781_v15 }
 0xa80   :  { %2619 = vmatprep.subr.bf16.mxu0 %v2781_v15 }
 0xa83   :  { %2620 = vmatpush3.bf16.msra.mxu0 %v2720_v24 }
 0xa84   :  { %2633 = vmatprep.subr.bf16.mxu0 %v2781_v15 }
 0xa86   :  { %2622 = vmatmul.mubr.msk.bf16.vlgmr.msra.gmra.mxu0 %vm59_vm0, %v2906_v34 }
 0xa87   :  { %2634 = vmatpush3.bf16.msra.mxu0 %v2721_v25  ;;  %2637 = vmatprep.mubr.msk.bf16.mxu0 %vm2782_vm1, %v2781_v15 }
 0xa88   :  { %2635 = vmatprep.subr.bf16.mxu0 %v2781_v15 }
 0xa8b   :  { %2636 = vmatpush3.bf16.msra.mxu0 %v2722_v26 }
 0xa8c   :  { %2647 = vmatprep.subr.bf16.mxu0 %v2781_v15 }
 0xa8e   :  { %2638 = vmatmul.mubr.msk.bf16.vlgmr.msra.gmra.mxu0 %vm59_vm0, %v2906_v34 }
 0xa8f   :  { %2649 = vmatprep.mubr.msk.bf16.mxu0 %vm2782_vm1, %v2781_v15 }
 0xb3a   :  { %v1401_v31 = vpop.f32.mrf.mxu1 }
 0xb3c   :  { %v2603_v32 = vpop.f32.mrf.mxu1 }
 0xb3e   :  { %v1404_v33 = vpop.f32.mrf.mxu1  ;;  %v1447_v35 = vpop.f32.mrf.mxu0 }
 0xb3f   :  { %v1453_v37 = vpack.c.bf16 %v1447_v35, %v1401_v31 }
 0xb40   :  { %v2604_v38 = vpop.f32.mrf.mxu1  ;;  %v2609_v39 = vpop.f32.mrf.mxu0 }
 0xb41   :  { %2614 = vmatmul.mubr.msk.bf16.vlgmr.msra.gmra.mxu1 %vm312_vm2, %v1453_v37 }
 0xb42   :  { %v1450_v40 = vpop.f32.mrf.mxu0  ;;  %2626 = vmatpush3.bf16.msra.mxu1 %v2723_v36  ;;  %2629 = vmatprep.mubr.msk.bf16.mxu1 %vm2782_vm1, %v2781_v15 }
 0xb43   :  { %2627 = vmatprep.subr.bf16.mxu1 %v2781_v15 }
 0xb44   :  { %v2610_v42 = vpop.f32.mrf.mxu0 }
 0xb46   :  { %v1564_v43 = vpop.f32.mrf.mxu0  ;;  %2628 = vmatpush3.bf16.msra.mxu1 %v2724_v41 }
 0xb47   :  { %2641 = vmatprep.subr.bf16.mxu1 %v2781_v15  ;;  %v1565_v2 = vadd.f32 %v2323_v13, %v1564_v43 }
 0xb48   :  { %v2623_v44 = vpop.f32.mrf.mxu0 }
 0xb49   :  { %2630 = vmatmul.mubr.msk.bf16.vlgmr.msra.gmra.mxu1 %vm59_vm0, %v2906_v34  ;;  %v1571_v7 = vpack.c.bf16 %v1565_v2, %v1565_v2 }
 0xb4a   :  { %v1567_v45 = vpop.f32.mrf.mxu0  ;;  %2643 = vmatprep.mubr.msk.bf16.mxu1 %vm2782_vm1, %v2781_v15 }
 0xb4b   :  { %v1568_v9 = vadd.f32 %v2323_v13, %v1567_v45 }
 0xb4c   :  { %v2624_v46 = vpop.f32.mrf.mxu0 }
 0xb4d   :  { %v1572_v14 = vpack.c.bf16 %v1568_v9, %v1568_v9 }
 0xb4e   :  { %v1700_v48 = vpop.f32.mrf.mxu0 }
 0xb4f   :  { %v1701_v51 = vadd.f32 %v2341_v10, %v1700_v48 }
 0xb50   :  { %v2639_v49 = vpop.f32.mrf.mxu0 }
 0xb51   :  { %v1707_v4 = vpack.c.bf16 %v1701_v51, %v1701_v51 }
 0xb52   :  { %v1703_v52 = vpop.f32.mrf.mxu0 }
 0xb53   :  { %v1704_v5 = vadd.f32 %v2341_v10, %v1703_v52  ;;  %v1831_v11 = vsel %vm436_vm3, %v1707_v4, 0  ;;  %v2349_v52 = vld [vmem:[%s3343_s9 + $0xc] sm:$0xf] }
 0xb54   :  { %v2640_v53 = vpop.f32.mrf.mxu0 }
 0xb55   :  { %v1708_v12 = vpack.c.bf16 %v1704_v5, %v1704_v5  ;;  %v1926_v53 = vsel %vm436_vm3, %v2349_v52, 0  ;;  %v2354_v52 = vld [vmem:[%s3349_s14] ss:$0 sm:$0xff] }
 0xb57   :  { %v1877_v16 = vsel %vm436_vm3, %v1708_v12, 0 }
 0xc01   :  { %v1496_v55 = vpop.f32.mrf.mxu1 }
 0xc02   :  { %v3199_v56 = vadd.f32 %v1496_v55, %v1033_v54 }
 0xc03   :  { %v2615_v57 = vpop.f32.mrf.mxu1 }
 0xc05   :  { %v1499_v34 = vpop.f32.mrf.mxu1 }
 0xc06   :  { %v3203_v59 = vadd.f32 %v1499_v34, %v1036_v58 }
 0xc07   :  { %v2616_v60 = vpop.f32.mrf.mxu1 }
 0xc09   :  { %v1632_v62 = vpop.f32.mrf.mxu1 }
 0xc0a   :  { %v1633_v47 = vadd.f32 %v2332_v61, %v1632_v62 }
 0xc0b   :  { %v2631_v28 = vpop.f32.mrf.mxu1 }
 0xc0c   :  { %v1639_v50 = vpack.c.bf16 %v1633_v47, %v1633_v47 }
 0xc0d   :  { %v1635_v30 = vpop.f32.mrf.mxu1 }
 0xc0e   :  { %v1713_v63 = vsel %vm312_vm2, %v1639_v50, 0  ;;  %v1636_v0 = vadd.f32 %v2332_v61, %v1635_v30  ;;  %v2351_v50 = vld [vmem:[%s3344_s10] ss:$0 sm:$0xff] }
 0xc0f   :  { %v2632_v1 = vpop.f32.mrf.mxu1  ;;  %2642 = vmatpush3.bf16.xpose.msra.mxu1 %v1713_v63  ;;  %v2779_v30 = vld [vmem:[%s3356_s26] sm:$0xff] }
 0xc10   :  { %v1640_v3 = vpack.c.bf16 %v1636_v0, %v1636_v0  ;;  %2653 = vmatprep.subr.bf16.mxu1 %v2781_v15 }
 0xc12   :  { %v1759_v6 = vsel %vm312_vm2, %v1640_v3, 0 }
 0xc13   :  { %2648 = vmatpush3.bf16.xpose.msra.mxu0 %v1759_v6 }
 0xc14   :  { %2659 = vmatprep.subr.bf16.mxu0 %v2781_v15 }
 0xc16   :  { %2644 = vmatmul.mubr.msk.bf16.vlgmr.msra.gmra.mxu1 %vm312_vm2, %v1571_v7 }
 0xc17   :  { %2654 = vmatpush3.bf16.msra.mxu1 %v1831_v11  ;;  %2655 = vmatprep.mubr.msk.bf16.mxu1 %vm2782_vm1, %v2781_v15 }
 0xc18   :  { %2665 = vmatprep.subr.bf16.mxu1 %v2781_v15 }
 0xc1a   :  { %2650 = vmatmul.mubr.msk.bf16.vlgmr.msra.gmra.mxu0 %vm312_vm2, %v1572_v14 }
 0xc1b   :  { %2660 = vmatpush3.bf16.msra.mxu0 %v1877_v16  ;;  %2661 = vmatprep.mubr.msk.bf16.mxu0 %vm2782_vm1, %v2781_v15 }
 0xc1c   :  { %2671 = vmatprep.subr.bf16.mxu0 %v2781_v15 }
 0xcd6   :  { %v1749_v17 = vpop.f32.mrf.mxu1 }
 0xcd7   :  { %v1801_v18 = vsel %vm2956_vm4, %v1749_v17, -1e+30 }
 0xcd8   :  { %v2645_v19 = vpop.f32.mrf.mxu1  ;;  %v1803_v20 = vsel %vm312_vm2, %v1801_v18, -inf }
 0xcd9   :  { %1804 = vmax.xlane.f32.xlu0 %v1803_v20  ;;  %v2725_v20 = vld [vmem:[%s3345_s13 + $0x8] sm:$0xff]  }
 0xcda   :  { %v1752_v21 = vpop.f32.mrf.mxu1  ;;  %v1795_v22 = vpop.f32.mrf.mxu0 }
 0xcdb   :  { %v1802_v23 = vsel %vm2956_vm4, %v1795_v22, -1e+30  ;;  %v2726_v21 = vld [vmem:[%s3345_s13] sm:$0xff]  }
 0xcdc   :  { %v2646_v24 = vpop.f32.mrf.mxu1  ;;  %v2651_v25 = vpop.f32.mrf.mxu0  ;;  %v1806_v26 = vsel %vm312_vm2, %v1802_v23, -inf }
 0xcdd   :  { %1807 = vmax.xlane.f32.xlu1 %v1806_v26 }
 0xcde   :  { %v1798_v27 = vpop.f32.mrf.mxu0 }
 0xce0   :  { %v2652_v29 = vpop.f32.mrf.mxu0 }
 0xd62   :  { %v1805_v31 = vpop.xlane.xlu0 %1804 }
 0xd63   :  { %v1809_v32 = vsub.f32 %v1801_v18, %v1805_v31 }
 0xd65   :  { %v1811_v33 = vmul.f32 1.442695, %v1809_v32  ;;  %v2352_v32 = vld [vmem:[%s3346_s11] ss:$0 sm:$0xff] }
 0xd66   :  { %v1808_v35 = vpop.xlane.xlu1 %1807 }
 0xd67   :  { %2763 = vpow2.f32 %v1811_v33  ;;  %v1810_v36 = vsub.f32 %v1802_v23, %v1808_v35 }
 0xd69   :  { %v1813_v37 = vmul.f32 1.442695, %v1810_v36 }
 0xd6b   :  { %2765 = vpow2.f32 %v1813_v37  ;;  %v2353_v37 = vld [vmem:[%s3347_s12] ss:$0 sm:$0xff] }
 0xd74   :  { %v2764_v38 = vpop.eup %2763 }
 0xd75   :  { %v1815_v39 = vsel %vm312_vm2, %v2764_v38, 0.0 }
 0xd76   :  { %1816 = vadd.xlane.f32.xlu0 %v1815_v39 }
 0xd78   :  { %v2766_v8 = vpop.eup %2765 }
 0xd79   :  { %v1818_v40 = vsel %vm312_vm2, %v2766_v8, 0.0 }
 0xd7a   :  { %1819 = vadd.xlane.f32.xlu1 %v1818_v40 }
 0xdff   :  { %v1817_v41 = vpop.xlane.xlu0 %1816 }
 0xe00   :  { %2767 = vrcp.f32 %v1817_v41  ;;  %v2727_v41 = vld [vmem:[%s3348_s15 + $0x38] sm:$0xff]  }
 0xe03   :  { %v1820_v42 = vpop.xlane.xlu1 %1819 }
 0xe04   :  { %2769 = vrcp.f32 %v1820_v42  ;;  %v2728_v42 = vld [vmem:[%s3348_s15 + $0x30] sm:$0xff]  }
 0xe0d   :  { %v2768_v43 = vpop.eup %2767 }
 0xe0e   :  { %v1823_v44 = vmul.f32 %v2768_v43, %v2764_v38  ;;  %v2729_v43 = vld [vmem:[%s3348_s15 + $0x28] sm:$0xff]  }
 0xe10   :  { %v1825_v45 = vpack.c.bf16 %v1823_v44, %v1823_v44  ;;  %v2730_v44 = vld [vmem:[%s3348_s15 + $0x20] sm:$0xff]  }
 0xe11   :  { %v2770_v46 = vpop.eup %2769 }
 0xe12   :  { %2656 = vmatmul.mubr.msk.bf16.vlgmr.msra.gmra.mxu1 %vm312_vm2, %v1825_v45  ;;  %v1824_v48 = vmul.f32 %v2770_v46, %v2766_v8  ;;  %v2731_v45 = vld [vmem:[%s3348_s15 + $0x18] sm:$0xff]   ;;  %v2732_v46 = vld [vmem:[%s3348_s15 + $0x10] sm:$0xff]  }
 0xe13   :  { %2667 = vmatprep.mubr.msk.bf16.mxu1 %vm2782_vm1, %v2781_v15  ;;  %2666 = vmatpush3.bf16.msra.mxu1 %v1926_v53 }
 0xe14   :  { %v1826_v49 = vpack.c.bf16 %v1824_v48, %v1824_v48  ;;  %2679 = vmatprep.subr.bf16.mxu1 %v2781_v15  ;;  %v2733_v48 = vld [vmem:[%s3348_s15 + $0x8] sm:$0xff]  }
 0xe16   :  { %2662 = vmatmul.mubr.msk.bf16.vlgmr.msra.gmra.mxu0 %vm312_vm2, %v1826_v49  ;;  %v2734_v49 = vld [vmem:[%s3348_s15] sm:$0xff]  }
 0xe17   :  { %2675 = vmatprep.mubr.msk.bf16.mxu0 %vm2782_vm1, %v2781_v15  ;;  %2672 = vmatpush3.bf16.msra.mxu0 %v2725_v20 }
 0xe18   :  { %2673 = vmatprep.subr.bf16.mxu0 %v2781_v15 }
 0xe1b   :  { %2674 = vmatpush3.bf16.msra.mxu0 %v2726_v21 }
 0xed2   :  { %v1867_v54 = vpop.f32.mrf.mxu1 }
 0xed4   :  { %v2657_v55 = vpop.f32.mrf.mxu1 }
 0xed6   :  { %v1870_v57 = vpop.f32.mrf.mxu1  ;;  %v1913_v58 = vpop.f32.mrf.mxu0 }
 0xed7   :  { %v1919_v34 = vpack.c.bf16 %v1913_v58, %v1867_v54 }
 0xed8   :  { %v2658_v60 = vpop.f32.mrf.mxu1  ;;  %v2663_v61 = vpop.f32.mrf.mxu0 }
 0xed9   :  { %2668 = vmatmul.mubr.msk.bf16.vlgmr.msra.gmra.mxu1 %vm312_vm2, %v1919_v34 }
 0xeda   :  { %v1916_v62 = vpop.f32.mrf.mxu0  ;;  %2695 = vmatprep.mubr.msk.bf16.mxu1 %vm2782_vm1, %v2781_v15  ;;  %2680 = vmatpush3.bf16.msra.mxu1 %v2727_v41 }
 0xedb   :  { %2681 = vmatprep.subr.bf16.mxu1 %v2781_v15 }
 0xedc   :  { %v2664_v47 = vpop.f32.mrf.mxu0 }
 0xede   :  { %2682 = vmatpush3.bf16.msra.mxu1 %v2728_v42 }
 0xedf   :  { %2683 = vmatprep.subr.bf16.mxu1 %v2781_v15 }
 0xee2   :  { %2684 = vmatpush3.bf16.msra.mxu1 %v2729_v43 }
 0xee3   :  { %2685 = vmatprep.subr.bf16.mxu1 %v2781_v15 }
 0xee6   :  { %2686 = vmatpush3.bf16.msra.mxu1 %v2730_v44 }
 0xee7   :  { %2687 = vmatprep.subr.bf16.mxu1 %v2781_v15 }
 0xeea   :  { %2688 = vmatpush3.bf16.msra.mxu1 %v2731_v45 }
 0xeeb   :  { %2689 = vmatprep.subr.bf16.mxu1 %v2781_v15 }
 0xeee   :  { %2690 = vmatpush3.bf16.msra.mxu1 %v2732_v46 }
 0xeef   :  { %2691 = vmatprep.subr.bf16.mxu1 %v2781_v15 }
 0xef2   :  { %2692 = vmatpush3.bf16.msra.mxu1 %v2733_v48 }
 0xef3   :  { %2693 = vmatprep.subr.bf16.mxu1 %v2781_v15 }
 0xef6   :  { %2694 = vmatpush3.bf16.msra.mxu1 %v2734_v49 }
 0xf99   :  { %v1962_v10 = vpop.f32.mrf.mxu1 }
 0xf9a   :  { %v1969_v28 = vadd.f32 %v1962_v10, %v3199_v56  ;;  %v2780_v56 = vld [vmem:[%s3356_s26 + $0x8] sm:$0xff] }
 0xf9b   :  { %v2669_v13 = vpop.f32.mrf.mxu1 }
 0xf9c   :  { %v1971_v51 = vadd.f32 %v2779_v30, %v1969_v28 }
 0xf9d   :  { %v1965_v63 = vpop.f32.mrf.mxu1 }
 0xf9e   :  { %v3257_v0 = vadd.f32 %v2351_v50, %v1971_v51  ;;  %v1970_v1 = vadd.f32 %v1965_v63, %v3203_v59 }
 0xf9f   :  { %v2670_v2 = vpop.f32.mrf.mxu1 }
 0xfa0   :  { %v1972_v3 = vadd.f32 %v2780_v56, %v1970_v1  ;;  %v1982_v4 = vsel %vm59_vm0, %v3257_v0, 0.0 }
 0xfa1   :  { %1983 = vadd.xlane.f32.xlu0 %v1982_v4 }
 0xfa2   :  { %v3265_v5 = vadd.f32 %v2351_v50, %v1972_v3 }
 0xfa4   :  { %v1985_v6 = vsel %vm59_vm0, %v3265_v5, 0.0 }
 0xfa5   :  { %1986 = vadd.xlane.f32.xlu1 %v1985_v6 }
0x102a   :  { %v1984_v7 = vpop.xlane.xlu0 %1983 }
0x102b   :  { %v1988_v9 = vmul.f32 0.03125, %v1984_v7 }
0x102d   :  { %v1990_v59 = vsub.f32 %v3257_v0, %v1988_v9  ;;  %v2358_v9 = vld [vmem:[%s3350_s16] ss:$0 sm:$0xff] }
0x102e   :  { %v1987_v11 = vpop.xlane.xlu1 %1986 }
0x102f   :  { %v1989_v12 = vmul.f32 0.03125, %v1987_v11  ;;  %v1992_v14 = vmul.f32 %v1990_v59, %v1990_v59 }
0x1031   :  { %v1991_v16 = vsub.f32 %v3265_v5, %v1989_v12  ;;  %v1994_v17 = vsel %vm59_vm0, %v1992_v14, 0.0 }
0x1032   :  { %1995 = vadd.xlane.f32.xlu0 %v1994_v17 }
0x1033   :  { %v1993_v18 = vmul.f32 %v1991_v16, %v1991_v16 }
0x1035   :  { %v1997_v19 = vsel %vm59_vm0, %v1993_v18, 0.0 }
0x1036   :  { %1998 = vadd.xlane.f32.xlu1 %v1997_v19 }
0x10bb   :  { %v1996_v22 = vpop.xlane.xlu0 %1995 }
0x10bc   :  { %v2000_v23 = vmul.f32 0.03125, %v1996_v22 }
0x10be   :  { %v2002_v24 = vadd.f32 1e-05, %v2000_v23 }
0x10bf   :  { %v1999_v25 = vpop.xlane.xlu1 %1998 }
0x10c0   :  { %2771 = vrsqrt.f32 %v2002_v24  ;;  %v2001_v26 = vmul.f32 0.03125, %v1999_v25 }
0x10c2   :  { %v2003_v27 = vadd.f32 1e-05, %v2001_v26 }
0x10c4   :  { %2773 = vrsqrt.f32 %v2003_v27 }
0x10cd   :  { %v2772_v29 = vpop.eup %2771 }
0x10ce   :  { %v2006_v31 = vmul.f32 %v2772_v29, %v1990_v59 }
0x10d0   :  { %v2015_v36 = vmul.f32 %v2352_v32, %v2006_v31 }
0x10d1   :  { %v2774_v33 = vpop.eup %2773 }
0x10d2   :  { %v2007_v35 = vmul.f32 %v2774_v33, %v1991_v16  ;;  %v2024_v39 = vadd.f32 %v2353_v37, %v2015_v36 }
0x10d4   :  { %v2016_v38 = vmul.f32 %v2352_v32, %v2007_v35 }
0x10d6   :  { %v2025_v8 = vadd.f32 %v2353_v37, %v2016_v38 }
0x10d8   :  { %v2026_v40 = vpack.c.bf16 %v2025_v8, %v2024_v39 }
0x10da   :  { %2676 = vmatmul.mubr.msk.bf16.vlgmr.msra.gmra.mxu0 %vm59_vm0, %v2026_v40 }
0x119a   :  { %v2087_v53 = vpop.f32.mrf.mxu0 }
0x119b   :  { %v2088_v54 = vadd.f32 %v2354_v52, %v2087_v53 }
0x119c   :  { %v2677_v55 = vpop.f32.mrf.mxu0 }
0x119d   :  { %v2096_v57 = vmul.f32 0.044715, %v2088_v54  ;;  %v2094_v2 = vmul.f32 0.5, %v2088_v54 }
0x119e   :  { %v2090_v58 = vpop.f32.mrf.mxu0 }
0x119f   :  { %v2098_v34 = vmul.f32 %v2096_v57, %v2088_v54  ;;  %v2091_v60 = vadd.f32 %v2354_v52, %v2090_v58 }
0x11a0   :  { %v2678_v61 = vpop.f32.mrf.mxu0 }
0x11a1   :  { %v2100_v62 = vmul.f32 %v2098_v34, %v2088_v54  ;;  %v2097_v47 = vmul.f32 0.044715, %v2091_v60  ;;  %v2095_v56 = vmul.f32 0.5, %v2091_v60 }
0x11a3   :  { %v2102_v10 = vadd.f32 %v2100_v62, %v2088_v54  ;;  %v2099_v28 = vmul.f32 %v2097_v47, %v2091_v60 }
0x11a5   :  { %v2104_v50 = vmul.f32 0.7978846, %v2102_v10  ;;  %v2101_v13 = vmul.f32 %v2099_v28, %v2091_v60 }
0x11a7   :  { %2775 = vtanh.f32 %v2104_v50  ;;  %v2103_v15 = vadd.f32 %v2101_v13, %v2091_v60 }
0x11a9   :  { %v2105_v30 = vmul.f32 0.7978846, %v2103_v15 }
0x11ab   :  { %2777 = vtanh.f32 %v2105_v30 }
0x11b4   :  { %v2776_v51 = vpop.eup %2775 }
0x11b5   :  { %v2108_v63 = vadd.f32 1.0, %v2776_v51 }
0x11b7   :  { %v2110_v4 = vmul.f32 %v2108_v63, %v2094_v2 }
0x11b8   :  { %v2778_v1 = vpop.eup %2777 }
0x11b9   :  { %v2109_v3 = vadd.f32 1.0, %v2778_v1 }
0x11bb   :  { %v2111_v6 = vmul.f32 %v2109_v3, %v2095_v56 }
0x11bd   :  { %v2112_v7 = vpack.c.bf16 %v2111_v6, %v2110_v4 }
0x11bf   :  { %2696 = vmatmul.mubr.bf16.vlgmr.msra.gmra.mxu1 %v2112_v7 }
0x127f   :  { %v2218_v59 = vpop.f32.mrf.mxu1 }
0x1280   :  { %v2219_v11 = vadd.f32 %v2358_v9, %v2218_v59 }
0x1281   :  { %v2697_v12 = vpop.f32.mrf.mxu1 }
0x1282   :  { %v2225_v14 = vadd.f32 %v2219_v11, %v3257_v0 }
0x1283   :  { %v2221_v16 = vpop.f32.mrf.mxu1 }
0x1284   :  { %2227 = vst.msk [vmem:[%s3351_s17] sm:$0xff] %vm59_vm0, %v2225_v14  ;;  %v2222_v17 = vadd.f32 %v2358_v9, %v2221_v16 }
0x1285   :  { %v2698_v18 = vpop.f32.mrf.mxu1 }
0x1286   :  { %v2226_v19 = vadd.f32 %v2222_v17, %v3265_v5 }
0x1288   :  { %2228 = vst.msk [vmem:[%s3351_s17 + $0x8] sm:$0xff] %vm59_vm0, %v2226_v19 }

</bundles_post_ra>
